<compile_context>
chip_gen: v7x
topology: tpu7x:2x2x1
jax: 0.10.0
libtpu: 0.0.40
codegen_flags: <defaults>
</compile_context>

<pallas_src>
import math
import jax
import jax.numpy as jnp
from jax import lax
from jax.experimental import pallas as pl
from jax.experimental.pallas import tpu as pltpu

# ----------------------------- model config (small, synthetic) -----------------------------
BATCH      = 2
SEQ        = 8
HIDDEN     = 32            # bert.config.hidden_size (small synthetic DistilBERT)
N_HEADS    = 2
HEAD_DIM   = HIDDEN // N_HEADS
FFN        = 4 * HIDDEN    # 128
N_LAYERS   = 2
VOCAB      = 100
MAX_POS    = 16
SHARED_DIM = 512           # shared_layer: Linear(hidden, 512)
HEAD_HID   = 256           # classifier hidden: Linear(512, 256)
N_ASPECT   = 5             # len(config.aspect_labels)
N_SENT     = 3             # len(config.sentiment_labels)
N_OUT      = N_ASPECT + N_SENT
OUT_LANES  = 128           # padded logits width (lane-dense store)
ASPECT_W   = 1.0           # config.aspect_weight
SENT_W     = 1.0           # config.sentiment_weight
LN_EPS     = 1e-12         # DistilBERT LayerNorm eps
BS         = BATCH * SEQ


def _layer_norm(x, g, b, eps=LN_EPS):
    mean = jnp.mean(x, axis=-1, keepdims=True)
    var = jnp.mean(jnp.square(x - mean), axis=-1, keepdims=True)
    return (x - mean) * lax.rsqrt(var + eps) * g + b


def _bf16(x):
    return x.astype(jnp.bfloat16)


def _to_heads(m):
    """(B*S, HIDDEN) -> (N_HEADS*BATCH, SEQ, HEAD_DIM); batch index n = h*BATCH + b."""
    return jnp.concatenate(
        [m[:, h * HEAD_DIM:(h + 1) * HEAD_DIM].reshape(BATCH, SEQ, HEAD_DIM)
         for h in range(N_HEADS)], axis=0)


def _from_heads(c):
    """(N_HEADS*BATCH, SEQ, HEAD_DIM) -> (B*S, HIDDEN), heads side-by-side in lanes."""
    return jnp.concatenate(
        [c[h * BATCH:(h + 1) * BATCH].reshape(BS, HEAD_DIM) for h in range(N_HEADS)], axis=1)


# ----------------------------- the single fused kernel (no grid) -----------------------------
def fused_forward_kernel(x_emb_ref, mask_ref, wqkv_ref, wo_ref, w1_ref, w2_ref,
                         lvecs_ref, w_sh_ref, w_h1_ref, w_h2_ref, misc_ref, out_ref):
    misc = misc_ref[...]                                      # (8, 512) f32
    # embedding LayerNorm
    x = _layer_norm(x_emb_ref[...], misc[5:6, :HIDDEN], misc[6:7, :HIDDEN])   # (B*S, H) f32
    mask_bias = mask_ref[...].reshape(N_HEADS * BATCH, 1, SEQ)                # additive key mask

    # ---- transformer layers, statically unrolled ----
    for l in range(N_LAYERS):
        lv = lvecs_ref[l]                                     # (8, FFN) f32 packed vectors
        x_bf = _bf16(x)
        qkv = (jnp.dot(x_bf, wqkv_ref[l], preferred_element_type=jnp.float32)
               + lv[0:1, :3 * HIDDEN]).astype(jnp.bfloat16)   # (B*S, 3H); scale folded into Q cols

        qh = _to_heads(qkv[:, :HIDDEN])                       # (NH*B, S, D) bf16
        kh = _to_heads(qkv[:, HIDDEN:2 * HIDDEN])
        vh = _to_heads(qkv[:, 2 * HIDDEN:])

        s = jnp.einsum('nqd,nkd->nqk', qh, kh,
                       preferred_element_type=jnp.float32) + mask_bias        # (NH*B, S, S)
        s = s - jnp.max(s, axis=-1, keepdims=True)
        p = jnp.exp(s)
        p = p * pl.reciprocal(jnp.sum(p, axis=-1, keepdims=True), approx=False)
        ctx = jnp.einsum('nqk,nkd->nqd', _bf16(p), vh,
                         preferred_element_type=jnp.float32)                  # (NH*B, S, D)

        ctx2 = _from_heads(ctx)                               # (B*S, H) f32, heads in lanes
        attn = jnp.dot(_bf16(ctx2), wo_ref[l],
                       preferred_element_type=jnp.float32) + lv[1:2, :HIDDEN]

        sa = _layer_norm(x + attn, lv[2:3, :HIDDEN], lv[3:4, :HIDDEN])
        h1 = jax.nn.gelu(jnp.dot(_bf16(sa), w1_ref[l],
                                 preferred_element_type=jnp.float32) + lv[4:5, :FFN])
        ffn = jnp.dot(_bf16(h1), w2_ref[l],
                      preferred_element_type=jnp.float32) + lv[5:6, :HIDDEN]
        x = _layer_norm(sa + ffn, lv[6:7, :HIDDEN], lv[7:8, :HIDDEN])

    # ---- CLS -> shared layer -> fused classifier heads -> BCE losses ----
    cls = jnp.concatenate([x[b * SEQ:b * SEQ + 1, :] for b in range(BATCH)], axis=0)  # (B, H)
    shared = jnp.maximum(
        jnp.dot(_bf16(cls), w_sh_ref[...],
                preferred_element_type=jnp.float32) + misc[0:1, :], 0.0)               # (B, 512)
    h12 = jnp.maximum(                                                                 # [ha | hs]
        jnp.dot(_bf16(shared), w_h1_ref[...],
                preferred_element_type=jnp.float32) + misc[1:2, :], 0.0)               # (B, 512)
    logits_pad = jnp.dot(_bf16(h12), w_h2_ref[...],           # block-diag, zero-padded to 128 lanes
                         preferred_element_type=jnp.float32) + misc[2:3, :OUT_LANES]   # (B, 128)

    logits = logits_pad[:, :N_OUT]
    yl = misc[3:3 + BATCH, :N_OUT]                            # labels = [aspect | sentiment]
    # stable BCEWithLogits: max(x,0) - x*y + log(1 + exp(-|x|))  (1+e^-|x| in [1,2] -> log is safe)
    per = (jnp.maximum(logits, 0.0) - logits * yl
           + jnp.log(1.0 + jnp.exp(-jnp.abs(logits))))
    a_loss = jnp.sum(per[:, :N_ASPECT], axis=(0, 1), keepdims=True) * (1.0 / (BATCH * N_ASPECT))
    s_loss = jnp.sum(per[:, N_ASPECT:], axis=(0, 1), keepdims=True) * (1.0 / (BATCH * N_SENT))
    total = ASPECT_W * a_loss + SENT_W * s_loss
    loss_row = jnp.concatenate(
        [a_loss, s_loss, total, jnp.zeros((1, OUT_LANES - 3), jnp.float32)], axis=1)   # (1, 128)

    # one lane-dense store: rows 0..B-1 = padded logits, row B = losses
    out_ref[...] = jnp.concatenate([logits_pad, loss_row], axis=0)                     # (B+1, 128)


# ----------------------------- cost estimate -----------------------------
def _cost_estimate(bytes_accessed):
    flops_layer = (2 * BS * HIDDEN * 3 * HIDDEN                         # fused QKV
                   + 2 * 2 * (N_HEADS * BATCH) * SEQ * SEQ * HEAD_DIM   # scores + ctx
                   + 2 * BS * HIDDEN * HIDDEN                           # output proj
                   + 2 * 2 * BS * HIDDEN * FFN)                         # FFN in/out
    flops_heads = (2 * BATCH * HIDDEN * SHARED_DIM
                   + 2 * BATCH * SHARED_DIM * 2 * HEAD_HID
                   + 2 * BATCH * 2 * HEAD_HID * OUT_LANES)
    trans = N_LAYERS * (N_HEADS * BATCH * SEQ * SEQ + BS * FFN) + BATCH * N_OUT
    return pl.CostEstimate(flops=int(N_LAYERS * flops_layer + flops_heads),
                           transcendentals=int(trans),
                           bytes_accessed=int(bytes_accessed))


# ----------------------------- full forward (one ungridded pallas_call) -----------------------------
def forward(packed, input_ids, attention_mask, aspect_labels, sentiment_labels):
    # glue (plain JAX): data-dependent embedding gather, additive mask bias, label packing
    emb = packed['word_emb'][input_ids] + packed['pos_emb'][:SEQ][None, :, :]
    x_emb = emb.reshape(BS, HIDDEN).astype(jnp.float32)
    mask_b = (attention_mask.astype(jnp.float32) - 1.0) * 1e9            # 0 keep / -1e9 pad, (B, S)
    mask_hb = jnp.tile(mask_b, (N_HEADS, 1))                             # (NH*B, S); n = h*B + b
    labels = jnp.concatenate([aspect_labels, sentiment_labels], axis=1).astype(jnp.float32)
    misc = packed['misc_base'].at[3:3 + BATCH, :N_OUT].set(labels)       # head biases + LN + labels

    args = (x_emb, mask_hb, packed['wqkv'], packed['wo'], packed['w1'], packed['w2'],
            packed['lvecs'], packed['w_sh'], packed['w_h1'], packed['w_h2'], misc)
    bytes_accessed = (sum(a.size * a.dtype.itemsize for a in args)
                      + (BATCH + 1) * OUT_LANES * 4)

    out = pl.pallas_call(
        fused_forward_kernel,
        out_shape=jax.ShapeDtypeStruct((BATCH + 1, OUT_LANES), jnp.float32),
        in_specs=[pl.BlockSpec(memory_space=pltpu.MemorySpace.VMEM)] * len(args),
        out_specs=pl.BlockSpec(memory_space=pltpu.MemorySpace.VMEM),
        cost_estimate=_cost_estimate(bytes_accessed),
    )(*args)

    logits = out[:BATCH, :N_OUT]
    return {
        'loss': out[BATCH, 2],
        'aspect_logits': logits[:, :N_ASPECT],
        'sentiment_logits': logits[:, N_ASPECT:],
        'aspect_loss': out[BATCH, 0],
        'sentiment_loss': out[BATCH, 1],
    }


# ----------------------------- parameter init (deterministic, synthetic) -----------------------------
def _dense(key, fan_in, fan_out):
    kw, kb = jax.random.split(key)
    w = jax.random.normal(kw, (fan_in, fan_out), jnp.float32) * 0.02
    b = jax.random.normal(kb, (1, fan_out), jnp.float32) * 0.02
    return w, b


def init_params(key):
    keys = iter(jax.random.split(key, 64))
    params = {}
    params['word_emb'] = jax.random.normal(next(keys), (VOCAB, HIDDEN), jnp.float32) * 0.02
    params['pos_emb'] = jax.random.normal(next(keys), (MAX_POS, HIDDEN), jnp.float32) * 0.02
    params['emb_ln_g'] = jnp.ones((1, HIDDEN), jnp.float32)
    params['emb_ln_b'] = jnp.zeros((1, HIDDEN), jnp.float32)

    layers = []
    for _ in range(N_LAYERS):
        wq, bq = _dense(next(keys), HIDDEN, HIDDEN)
        wk, bk = _dense(next(keys), HIDDEN, HIDDEN)
        wv, bv = _dense(next(keys), HIDDEN, HIDDEN)
        wo, bo = _dense(next(keys), HIDDEN, HIDDEN)
        w1, b1 = _dense(next(keys), HIDDEN, FFN)
        w2, b2 = _dense(next(keys), FFN, HIDDEN)
        layers.append(dict(
            wq=wq, bq=bq, wk=wk, bk=bk, wv=wv, bv=bv, wo=wo, bo=bo,
            ln1g=jnp.ones((1, HIDDEN), jnp.float32), ln1b=jnp.zeros((1, HIDDEN), jnp.float32),
            w1=w1, b1=b1, w2=w2, b2=b2,
            ln2g=jnp.ones((1, HIDDEN), jnp.float32), ln2b=jnp.zeros((1, HIDDEN), jnp.float32)))
    params['layers'] = layers

    wsh, bsh = _dense(next(keys), HIDDEN, SHARED_DIM)
    wa1, ba1 = _dense(next(keys), SHARED_DIM, HEAD_HID)
    wa2, ba2 = _dense(next(keys), HEAD_HID, N_ASPECT)
    ws1, bs1 = _dense(next(keys), SHARED_DIM, HEAD_HID)
    ws2, bs2 = _dense(next(keys), HEAD_HID, N_SENT)
    params['heads'] = dict(wsh=wsh, bsh=bsh, wa1=wa1, ba1=ba1, wa2=wa2, ba2=ba2,
                           ws1=ws1, bs1=bs1, ws2=ws2, bs2=bs2)
    return params


def pack_params(params):
    """Stack per-layer weights, fuse QKV / classifier branches, pack small vectors, bf16-cast matmul weights."""
    scale = 1.0 / math.sqrt(HEAD_DIM)

    def stack(fn):
        return jnp.stack([fn(lp) for lp in params['layers']], axis=0)

    def pad_row(v):
        return jnp.pad(v, ((0, 0), (0, FFN - v.shape[1])))

    def layer_vecs(p):
        rows = [jnp.concatenate([p['bq'] * scale, p['bk'], p['bv']], axis=1),  # bqkv (1, 3H)
                p['bo'], p['ln1g'], p['ln1b'], p['b1'], p['b2'], p['ln2g'], p['ln2b']]
        return jnp.concatenate([pad_row(r) for r in rows], axis=0)             # (8, FFN)

    packed = {
        'word_emb': params['word_emb'],
        'pos_emb': params['pos_emb'],
        # softmax 1/sqrt(d) folded into the Q columns of the fused QKV projection
        'wqkv': stack(lambda p: jnp.concatenate(
            [p['wq'] * scale, p['wk'], p['wv']], axis=1)).astype(jnp.bfloat16),
        'wo': stack(lambda p: p['wo']).astype(jnp.bfloat16),
        'w1': stack(lambda p: p['w1']).astype(jnp.bfloat16),
        'w2': stack(lambda p: p['w2']).astype(jnp.bfloat16),
        'lvecs': stack(layer_vecs),                                            # (L, 8, FFN) f32
    }
    h = params['heads']
    packed['w_sh'] = h['wsh'].astype(jnp.bfloat16)
    packed['w_h1'] = jnp.concatenate([h['wa1'], h['ws1']], axis=1).astype(jnp.bfloat16)
    w_h2 = jnp.zeros((2 * HEAD_HID, OUT_LANES), jnp.float32)                   # block-diag, lane-padded
    w_h2 = w_h2.at[:HEAD_HID, :N_ASPECT].set(h['wa2'])
    w_h2 = w_h2.at[HEAD_HID:, N_ASPECT:N_OUT].set(h['ws2'])
    packed['w_h2'] = w_h2.astype(jnp.bfloat16)

    # misc rows: 0=b_sh, 1=b_h1, 2=b_h2(padded), 3..3+B-1=labels(filled per call), 5/6=emb LN g/b
    misc = jnp.zeros((8, SHARED_DIM), jnp.float32)
    misc = misc.at[0, :].set(h['bsh'][0])
    misc = misc.at[1, :HEAD_HID].set(h['ba1'][0])
    misc = misc.at[1, HEAD_HID:].set(h['bs1'][0])
    misc = misc.at[2, :N_ASPECT].set(h['ba2'][0])
    misc = misc.at[2, N_ASPECT:N_OUT].set(h['bs2'][0])
    misc = misc.at[5, :HIDDEN].set(params['emb_ln_g'][0])
    misc = misc.at[6, :HIDDEN].set(params['emb_ln_b'][0])
    packed['misc_base'] = misc
    return packed


if __name__ == "__main__":
    key = jax.random.PRNGKey(0)
    k_param, k_ids, k_ya, k_ys = jax.random.split(key, 4)

    params = init_params(k_param)
    packed = pack_params(params)

    input_ids = jax.random.randint(k_ids, (BATCH, SEQ), 0, VOCAB, dtype=jnp.int32)
    attention_mask = jnp.ones((BATCH, SEQ), jnp.int32).at[1, 6:].set(0)   # second example padded
    aspect_labels = jax.random.bernoulli(k_ya, 0.5, (BATCH, N_ASPECT)).astype(jnp.float32)
    sentiment_labels = jax.random.bernoulli(k_ys, 0.5, (BATCH, N_SENT)).astype(jnp.float32)

    fwd = jax.jit(forward)
    out = fwd(packed, input_ids, attention_mask, aspect_labels, sentiment_labels)
    out = jax.block_until_ready(out)

    assert out['aspect_logits'].shape == (BATCH, N_ASPECT)
    assert out['sentiment_logits'].shape == (BATCH, N_SENT)
    assert out['loss'].shape == ()
    assert out['aspect_loss'].shape == () and out['sentiment_loss'].shape == ()
    print("KERNEL_OK")
</pallas_src>

<mosaic_0001>
module attributes {stable_mosaic.version = 11 : i64} {
  func.func @fused_forward_kernel(%arg0: memref<16x32xf32, #tpu.memory_space<vmem>>, %arg1: memref<4x8xf32, #tpu.memory_space<vmem>>, %arg2: memref<2x32x96xbf16, #tpu.memory_space<vmem>>, %arg3: memref<2x32x32xbf16, #tpu.memory_space<vmem>>, %arg4: memref<2x32x128xbf16, #tpu.memory_space<vmem>>, %arg5: memref<2x128x32xbf16, #tpu.memory_space<vmem>>, %arg6: memref<2x8x128xf32, #tpu.memory_space<vmem>>, %arg7: memref<32x512xbf16, #tpu.memory_space<vmem>>, %arg8: memref<512x512xbf16, #tpu.memory_space<vmem>>, %arg9: memref<512x128xbf16, #tpu.memory_space<vmem>>, %arg10: memref<8x512xf32, #tpu.memory_space<vmem>>, %arg11: memref<3x128xf32, #tpu.memory_space<vmem>>) attributes {dimension_semantics = [], scalar_prefetch = 0 : i64, scratch_operands = 0 : i64, tpu.core_type = #tpu.core_type<tc>} {
    %c0 = arith.constant 0 : index
    %c0_0 = arith.constant 0 : index
    %0 = vector.load %arg10[%c0, %c0_0] : memref<8x512xf32, #tpu.memory_space<vmem>>, vector<8x512xf32>
    %c0_1 = arith.constant 0 : index
    %c0_2 = arith.constant 0 : index
    %1 = vector.load %arg0[%c0_1, %c0_2] : memref<16x32xf32, #tpu.memory_space<vmem>>, vector<16x32xf32>
    %2 = vector.extract_strided_slice %0 {offsets = [5, 0], sizes = [1, 32], strides = [1, 1]} : vector<8x512xf32> to vector<1x32xf32>
    %3 = vector.extract_strided_slice %0 {offsets = [6, 0], sizes = [1, 32], strides = [1, 1]} : vector<8x512xf32> to vector<1x32xf32>
    %cst = arith.constant dense<0.000000e+00> : vector<16xf32>
    %4 = vector.multi_reduction <add>, %1, %cst [1] : vector<16x32xf32> to vector<16xf32>
    %5 = vector.shape_cast %4 : vector<16xf32> to vector<16x1xf32>
    %cst_3 = arith.constant 3.200000e+01 : f32
    %6 = vector.broadcast %cst_3 : f32 to vector<16x1xf32>
    %7 = arith.divf %5, %6 : vector<16x1xf32>
    %8 = vector.broadcast %7 : vector<16x1xf32> to vector<16x32xf32>
    %9 = arith.subf %1, %8 : vector<16x32xf32>
    %10 = arith.mulf %9, %9 : vector<16x32xf32>
    %cst_4 = arith.constant dense<0.000000e+00> : vector<16xf32>
    %11 = vector.multi_reduction <add>, %10, %cst_4 [1] : vector<16x32xf32> to vector<16xf32>
    %12 = vector.shape_cast %11 : vector<16xf32> to vector<16x1xf32>
    %cst_5 = arith.constant 3.200000e+01 : f32
    %13 = vector.broadcast %cst_5 : f32 to vector<16x1xf32>
    %14 = arith.divf %12, %13 : vector<16x1xf32>
    %15 = vector.broadcast %7 : vector<16x1xf32> to vector<16x32xf32>
    %16 = arith.subf %1, %15 : vector<16x32xf32>
    %cst_6 = arith.constant 9.99999996E-13 : f32
    %17 = vector.broadcast %cst_6 : f32 to vector<16x1xf32>
    %18 = arith.addf %14, %17 : vector<16x1xf32>
    %19 = math.rsqrt %18 : vector<16x1xf32>
    %20 = vector.broadcast %19 : vector<16x1xf32> to vector<16x32xf32>
    %21 = arith.mulf %16, %20 : vector<16x32xf32>
    %22 = vector.broadcast %2 : vector<1x32xf32> to vector<16x32xf32>
    %23 = arith.mulf %21, %22 : vector<16x32xf32>
    %24 = vector.broadcast %3 : vector<1x32xf32> to vector<16x32xf32>
    %25 = arith.addf %23, %24 : vector<16x32xf32>
    %c0_7 = arith.constant 0 : index
    %c0_8 = arith.constant 0 : index
    %26 = vector.load %arg1[%c0_7, %c0_8] : memref<4x8xf32, #tpu.memory_space<vmem>>, vector<4x8xf32>
    %27 = vector.shape_cast %26 : vector<4x8xf32> to vector<4x1x8xf32>
    %c0_9 = arith.constant 0 : index
    %c0_10 = arith.constant 0 : index
    %c0_11 = arith.constant 0 : index
    %28 = vector.load %arg6[%c0_9, %c0_10, %c0_11] : memref<2x8x128xf32, #tpu.memory_space<vmem>>, vector<1x8x128xf32>
    %29 = vector.shape_cast %28 : vector<1x8x128xf32> to vector<8x128xf32>
    %30 = arith.truncf %25 : vector<16x32xf32> to vector<16x32xbf16>
    %c0_12 = arith.constant 0 : index
    %c0_13 = arith.constant 0 : index
    %c0_14 = arith.constant 0 : index
    %31 = vector.load %arg2[%c0_12, %c0_13, %c0_14] : memref<2x32x96xbf16, #tpu.memory_space<vmem>>, vector<1x32x96xbf16>
    %32 = vector.shape_cast %31 : vector<1x32x96xbf16> to vector<32x96xbf16>
    %cst_15 = arith.constant dense<0.000000e+00> : vector<16x96xf32>
    %33 = tpu.matmul %30, %32, %cst_15 {dimension_numbers = #tpu.dot_dimension_numbers<[1], [0], [0], [1], [0, 0, 1, 1], [], []>} : vector<16x32xbf16>, vector<32x96xbf16>, vector<16x96xf32> -> vector<16x96xf32>
    %34 = vector.extract_strided_slice %29 {offsets = [0, 0], sizes = [1, 96], strides = [1, 1]} : vector<8x128xf32> to vector<1x96xf32>
    %35 = vector.broadcast %34 : vector<1x96xf32> to vector<16x96xf32>
    %36 = arith.addf %33, %35 : vector<16x96xf32>
    %37 = arith.truncf %36 : vector<16x96xf32> to vector<16x96xbf16>
    %38 = vector.extract_strided_slice %37 {offsets = [0, 0], sizes = [16, 32], strides = [1, 1]} : vector<16x96xbf16> to vector<16x32xbf16>
    %39 = vector.extract_strided_slice %38 {offsets = [0, 0], sizes = [16, 16], strides = [1, 1]} : vector<16x32xbf16> to vector<16x16xbf16>
    %40 = vector.shape_cast %39 : vector<16x16xbf16> to vector<2x8x16xbf16>
    %41 = vector.extract_strided_slice %38 {offsets = [0, 16], sizes = [16, 16], strides = [1, 1]} : vector<16x32xbf16> to vector<16x16xbf16>
    %42 = vector.shape_cast %41 : vector<16x16xbf16> to vector<2x8x16xbf16>
    %43 = tpu.concatenate %40, %42 in 0 : vector<2x8x16xbf16>, vector<2x8x16xbf16> -> vector<4x8x16xbf16>
    %44 = vector.extract_strided_slice %37 {offsets = [0, 32], sizes = [16, 32], strides = [1, 1]} : vector<16x96xbf16> to vector<16x32xbf16>
    %45 = vector.extract_strided_slice %44 {offsets = [0, 0], sizes = [16, 16], strides = [1, 1]} : vector<16x32xbf16> to vector<16x16xbf16>
    %46 = vector.shape_cast %45 : vector<16x16xbf16> to vector<2x8x16xbf16>
    %47 = vector.extract_strided_slice %44 {offsets = [0, 16], sizes = [16, 16], strides = [1, 1]} : vector<16x32xbf16> to vector<16x16xbf16>
    %48 = vector.shape_cast %47 : vector<16x16xbf16> to vector<2x8x16xbf16>
    %49 = tpu.concatenate %46, %48 in 0 : vector<2x8x16xbf16>, vector<2x8x16xbf16> -> vector<4x8x16xbf16>
    %50 = vector.extract_strided_slice %37 {offsets = [0, 64], sizes = [16, 32], strides = [1, 1]} : vector<16x96xbf16> to vector<16x32xbf16>
    %51 = vector.extract_strided_slice %50 {offsets = [0, 0], sizes = [16, 16], strides = [1, 1]} : vector<16x32xbf16> to vector<16x16xbf16>
    %52 = vector.shape_cast %51 : vector<16x16xbf16> to vector<2x8x16xbf16>
    %53 = vector.extract_strided_slice %50 {offsets = [0, 16], sizes = [16, 16], strides = [1, 1]} : vector<16x32xbf16> to vector<16x16xbf16>
    %54 = vector.shape_cast %53 : vector<16x16xbf16> to vector<2x8x16xbf16>
    %55 = tpu.concatenate %52, %54 in 0 : vector<2x8x16xbf16>, vector<2x8x16xbf16> -> vector<4x8x16xbf16>
    "tpu.trace_start"() <{level = 10 : i32, message = "nqd,nkd->nqk"}> : () -> ()
    %cst_16 = arith.constant dense<0.000000e+00> : vector<4x8x8xf32>
    %56 = tpu.matmul %43, %49, %cst_16 {dimension_numbers = #tpu.dot_dimension_numbers<[2], [2], [1], [1], [0, 0, 0, 1, 1, 1], [0], [0]>} : vector<4x8x16xbf16>, vector<4x8x16xbf16>, vector<4x8x8xf32> -> vector<4x8x8xf32>
    "tpu.trace_stop"() : () -> ()
    %57 = vector.broadcast %27 : vector<4x1x8xf32> to vector<4x8x8xf32>
    %58 = arith.addf %56, %57 : vector<4x8x8xf32>
    %cst_17 = arith.constant dense<0xFF800000> : vector<4x8xf32>
    %59 = vector.multi_reduction <maximumf>, %58, %cst_17 [2] : vector<4x8x8xf32> to vector<4x8xf32>
    %60 = vector.shape_cast %59 : vector<4x8xf32> to vector<4x8x1xf32>
    %61 = vector.broadcast %60 : vector<4x8x1xf32> to vector<4x8x8xf32>
    %62 = arith.subf %58, %61 : vector<4x8x8xf32>
    %63 = math.exp %62 : vector<4x8x8xf32>
    %cst_18 = arith.constant dense<0.000000e+00> : vector<4x8xf32>
    %64 = vector.multi_reduction <add>, %63, %cst_18 [2] : vector<4x8x8xf32> to vector<4x8xf32>
    %65 = vector.shape_cast %64 : vector<4x8xf32> to vector<4x8x1xf32>
    %66 = tpu.reciprocal %65 : vector<4x8x1xf32> -> vector<4x8x1xf32>
    %67 = vector.broadcast %66 : vector<4x8x1xf32> to vector<4x8x8xf32>
    %68 = arith.mulf %63, %67 : vector<4x8x8xf32>
    %69 = arith.truncf %68 : vector<4x8x8xf32> to vector<4x8x8xbf16>
    "tpu.trace_start"() <{level = 10 : i32, message = "nqk,nkd->nqd"}> : () -> ()
    %cst_19 = arith.constant dense<0.000000e+00> : vector<4x8x16xf32>
    %70 = tpu.matmul %69, %55, %cst_19 {dimension_numbers = #tpu.dot_dimension_numbers<[2], [1], [1], [2], [0, 0, 0, 1, 1, 2], [0], [0]>} : vector<4x8x8xbf16>, vector<4x8x16xbf16>, vector<4x8x16xf32> -> vector<4x8x16xf32>
    "tpu.trace_stop"() : () -> ()
    %71 = vector.extract_strided_slice %70 {offsets = [0, 0, 0], sizes = [2, 8, 16], strides = [1, 1, 1]} : vector<4x8x16xf32> to vector<2x8x16xf32>
    %72 = vector.shape_cast %71 : vector<2x8x16xf32> to vector<16x16xf32>
    %73 = vector.extract_strided_slice %70 {offsets = [2, 0, 0], sizes = [2, 8, 16], strides = [1, 1, 1]} : vector<4x8x16xf32> to vector<2x8x16xf32>
    %74 = vector.shape_cast %73 : vector<2x8x16xf32> to vector<16x16xf32>
    %75 = tpu.concatenate %72, %74 in 1 : vector<16x16xf32>, vector<16x16xf32> -> vector<16x32xf32>
    %76 = arith.truncf %75 : vector<16x32xf32> to vector<16x32xbf16>
    %c0_20 = arith.constant 0 : index
    %c0_21 = arith.constant 0 : index
    %c0_22 = arith.constant 0 : index
    %77 = vector.load %arg3[%c0_20, %c0_21, %c0_22] : memref<2x32x32xbf16, #tpu.memory_space<vmem>>, vector<1x32x32xbf16>
    %78 = vector.shape_cast %77 : vector<1x32x32xbf16> to vector<32x32xbf16>
    %cst_23 = arith.constant dense<0.000000e+00> : vector<16x32xf32>
    %79 = tpu.matmul %76, %78, %cst_23 {dimension_numbers = #tpu.dot_dimension_numbers<[1], [0], [0], [1], [0, 0, 1, 1], [], []>} : vector<16x32xbf16>, vector<32x32xbf16>, vector<16x32xf32> -> vector<16x32xf32>
    %80 = vector.extract_strided_slice %29 {offsets = [1, 0], sizes = [1, 32], strides = [1, 1]} : vector<8x128xf32> to vector<1x32xf32>
    %81 = vector.broadcast %80 : vector<1x32xf32> to vector<16x32xf32>
    %82 = arith.addf %79, %81 : vector<16x32xf32>
    %83 = arith.addf %25, %82 : vector<16x32xf32>
    %84 = vector.extract_strided_slice %29 {offsets = [2, 0], sizes = [1, 32], strides = [1, 1]} : vector<8x128xf32> to vector<1x32xf32>
    %85 = vector.extract_strided_slice %29 {offsets = [3, 0], sizes = [1, 32], strides = [1, 1]} : vector<8x128xf32> to vector<1x32xf32>
    %cst_24 = arith.constant dense<0.000000e+00> : vector<16xf32>
    %86 = vector.multi_reduction <add>, %83, %cst_24 [1] : vector<16x32xf32> to vector<16xf32>
    %87 = vector.shape_cast %86 : vector<16xf32> to vector<16x1xf32>
    %cst_25 = arith.constant 3.200000e+01 : f32
    %88 = vector.broadcast %cst_25 : f32 to vector<16x1xf32>
    %89 = arith.divf %87, %88 : vector<16x1xf32>
    %90 = vector.broadcast %89 : vector<16x1xf32> to vector<16x32xf32>
    %91 = arith.subf %83, %90 : vector<16x32xf32>
    %92 = arith.mulf %91, %91 : vector<16x32xf32>
    %cst_26 = arith.constant dense<0.000000e+00> : vector<16xf32>
    %93 = vector.multi_reduction <add>, %92, %cst_26 [1] : vector<16x32xf32> to vector<16xf32>
    %94 = vector.shape_cast %93 : vector<16xf32> to vector<16x1xf32>
    %cst_27 = arith.constant 3.200000e+01 : f32
    %95 = vector.broadcast %cst_27 : f32 to vector<16x1xf32>
    %96 = arith.divf %94, %95 : vector<16x1xf32>
    %97 = vector.broadcast %89 : vector<16x1xf32> to vector<16x32xf32>
    %98 = arith.subf %83, %97 : vector<16x32xf32>
    %cst_28 = arith.constant 9.99999996E-13 : f32
    %99 = vector.broadcast %cst_28 : f32 to vector<16x1xf32>
    %100 = arith.addf %96, %99 : vector<16x1xf32>
    %101 = math.rsqrt %100 : vector<16x1xf32>
    %102 = vector.broadcast %101 : vector<16x1xf32> to vector<16x32xf32>
    %103 = arith.mulf %98, %102 : vector<16x32xf32>
    %104 = vector.broadcast %84 : vector<1x32xf32> to vector<16x32xf32>
    %105 = arith.mulf %103, %104 : vector<16x32xf32>
    %106 = vector.broadcast %85 : vector<1x32xf32> to vector<16x32xf32>
    %107 = arith.addf %105, %106 : vector<16x32xf32>
    %108 = arith.truncf %107 : vector<16x32xf32> to vector<16x32xbf16>
    %c0_29 = arith.constant 0 : index
    %c0_30 = arith.constant 0 : index
    %c0_31 = arith.constant 0 : index
    %109 = vector.load %arg4[%c0_29, %c0_30, %c0_31] : memref<2x32x128xbf16, #tpu.memory_space<vmem>>, vector<1x32x128xbf16>
    %110 = vector.shape_cast %109 : vector<1x32x128xbf16> to vector<32x128xbf16>
    %cst_32 = arith.constant dense<0.000000e+00> : vector<16x128xf32>
    %111 = tpu.matmul %108, %110, %cst_32 {dimension_numbers = #tpu.dot_dimension_numbers<[1], [0], [0], [1], [0, 0, 1, 1], [], []>} : vector<16x32xbf16>, vector<32x128xbf16>, vector<16x128xf32> -> vector<16x128xf32>
    %112 = vector.extract_strided_slice %29 {offsets = [4, 0], sizes = [1, 128], strides = [1, 1]} : vector<8x128xf32> to vector<1x128xf32>
    %113 = vector.broadcast %112 : vector<1x128xf32> to vector<16x128xf32>
    %114 = arith.addf %111, %113 : vector<16x128xf32>
    %115 = arith.mulf %114, %114 : vector<16x128xf32>
    %116 = arith.mulf %114, %115 : vector<16x128xf32>
    %cst_33 = arith.constant 4.471500e-02 : f32
    %117 = vector.broadcast %cst_33 : f32 to vector<16x128xf32>
    %118 = arith.mulf %117, %116 : vector<16x128xf32>
    %119 = arith.addf %114, %118 : vector<16x128xf32>
    %cst_34 = arith.constant 0.797884583 : f32
    %120 = vector.broadcast %cst_34 : f32 to vector<16x128xf32>
    %121 = arith.mulf %120, %119 : vector<16x128xf32>
    %122 = math.tanh %121 : vector<16x128xf32>
    %cst_35 = arith.constant 1.000000e+00 : f32
    %123 = vector.broadcast %cst_35 : f32 to vector<16x128xf32>
    %124 = arith.addf %123, %122 : vector<16x128xf32>
    %cst_36 = arith.constant 5.000000e-01 : f32
    %125 = vector.broadcast %cst_36 : f32 to vector<16x128xf32>
    %126 = arith.mulf %125, %124 : vector<16x128xf32>
    %127 = arith.mulf %114, %126 : vector<16x128xf32>
    %128 = arith.truncf %127 : vector<16x128xf32> to vector<16x128xbf16>
    %c0_37 = arith.constant 0 : index
    %c0_38 = arith.constant 0 : index
    %c0_39 = arith.constant 0 : index
    %129 = vector.load %arg5[%c0_37, %c0_38, %c0_39] : memref<2x128x32xbf16, #tpu.memory_space<vmem>>, vector<1x128x32xbf16>
    %130 = vector.shape_cast %129 : vector<1x128x32xbf16> to vector<128x32xbf16>
    %cst_40 = arith.constant dense<0.000000e+00> : vector<16x32xf32>
    %131 = tpu.matmul %128, %130, %cst_40 {dimension_numbers = #tpu.dot_dimension_numbers<[1], [0], [0], [1], [0, 0, 1, 1], [], []>} : vector<16x128xbf16>, vector<128x32xbf16>, vector<16x32xf32> -> vector<16x32xf32>
    %132 = vector.extract_strided_slice %29 {offsets = [5, 0], sizes = [1, 32], strides = [1, 1]} : vector<8x128xf32> to vector<1x32xf32>
    %133 = vector.broadcast %132 : vector<1x32xf32> to vector<16x32xf32>
    %134 = arith.addf %131, %133 : vector<16x32xf32>
    %135 = arith.addf %107, %134 : vector<16x32xf32>
    %136 = vector.extract_strided_slice %29 {offsets = [6, 0], sizes = [1, 32], strides = [1, 1]} : vector<8x128xf32> to vector<1x32xf32>
    %137 = vector.extract_strided_slice %29 {offsets = [7, 0], sizes = [1, 32], strides = [1, 1]} : vector<8x128xf32> to vector<1x32xf32>
    %cst_41 = arith.constant dense<0.000000e+00> : vector<16xf32>
    %138 = vector.multi_reduction <add>, %135, %cst_41 [1] : vector<16x32xf32> to vector<16xf32>
    %139 = vector.shape_cast %138 : vector<16xf32> to vector<16x1xf32>
    %cst_42 = arith.constant 3.200000e+01 : f32
    %140 = vector.broadcast %cst_42 : f32 to vector<16x1xf32>
    %141 = arith.divf %139, %140 : vector<16x1xf32>
    %142 = vector.broadcast %141 : vector<16x1xf32> to vector<16x32xf32>
    %143 = arith.subf %135, %142 : vector<16x32xf32>
    %144 = arith.mulf %143, %143 : vector<16x32xf32>
    %cst_43 = arith.constant dense<0.000000e+00> : vector<16xf32>
    %145 = vector.multi_reduction <add>, %144, %cst_43 [1] : vector<16x32xf32> to vector<16xf32>
    %146 = vector.shape_cast %145 : vector<16xf32> to vector<16x1xf32>
    %cst_44 = arith.constant 3.200000e+01 : f32
    %147 = vector.broadcast %cst_44 : f32 to vector<16x1xf32>
    %148 = arith.divf %146, %147 : vector<16x1xf32>
    %149 = vector.broadcast %141 : vector<16x1xf32> to vector<16x32xf32>
    %150 = arith.subf %135, %149 : vector<16x32xf32>
    %cst_45 = arith.constant 9.99999996E-13 : f32
    %151 = vector.broadcast %cst_45 : f32 to vector<16x1xf32>
    %152 = arith.addf %148, %151 : vector<16x1xf32>
    %153 = math.rsqrt %152 : vector<16x1xf32>
    %154 = vector.broadcast %153 : vector<16x1xf32> to vector<16x32xf32>
    %155 = arith.mulf %150, %154 : vector<16x32xf32>
    %156 = vector.broadcast %136 : vector<1x32xf32> to vector<16x32xf32>
    %157 = arith.mulf %155, %156 : vector<16x32xf32>
    %158 = vector.broadcast %137 : vector<1x32xf32> to vector<16x32xf32>
    %159 = arith.addf %157, %158 : vector<16x32xf32>
    %c1 = arith.constant 1 : index
    %c0_46 = arith.constant 0 : index
    %c0_47 = arith.constant 0 : index
    %160 = vector.load %arg6[%c1, %c0_46, %c0_47] : memref<2x8x128xf32, #tpu.memory_space<vmem>>, vector<1x8x128xf32>
    %161 = vector.shape_cast %160 : vector<1x8x128xf32> to vector<8x128xf32>
    %162 = arith.truncf %159 : vector<16x32xf32> to vector<16x32xbf16>
    %c1_48 = arith.constant 1 : index
    %c0_49 = arith.constant 0 : index
    %c0_50 = arith.constant 0 : index
    %163 = vector.load %arg2[%c1_48, %c0_49, %c0_50] : memref<2x32x96xbf16, #tpu.memory_space<vmem>>, vector<1x32x96xbf16>
    %164 = vector.shape_cast %163 : vector<1x32x96xbf16> to vector<32x96xbf16>
    %cst_51 = arith.constant dense<0.000000e+00> : vector<16x96xf32>
    %165 = tpu.matmul %162, %164, %cst_51 {dimension_numbers = #tpu.dot_dimension_numbers<[1], [0], [0], [1], [0, 0, 1, 1], [], []>} : vector<16x32xbf16>, vector<32x96xbf16>, vector<16x96xf32> -> vector<16x96xf32>
    %166 = vector.extract_strided_slice %161 {offsets = [0, 0], sizes = [1, 96], strides = [1, 1]} : vector<8x128xf32> to vector<1x96xf32>
    %167 = vector.broadcast %166 : vector<1x96xf32> to vector<16x96xf32>
    %168 = arith.addf %165, %167 : vector<16x96xf32>
    %169 = arith.truncf %168 : vector<16x96xf32> to vector<16x96xbf16>
    %170 = vector.extract_strided_slice %169 {offsets = [0, 0], sizes = [16, 32], strides = [1, 1]} : vector<16x96xbf16> to vector<16x32xbf16>
    %171 = vector.extract_strided_slice %170 {offsets = [0, 0], sizes = [16, 16], strides = [1, 1]} : vector<16x32xbf16> to vector<16x16xbf16>
    %172 = vector.shape_cast %171 : vector<16x16xbf16> to vector<2x8x16xbf16>
    %173 = vector.extract_strided_slice %170 {offsets = [0, 16], sizes = [16, 16], strides = [1, 1]} : vector<16x32xbf16> to vector<16x16xbf16>
    %174 = vector.shape_cast %173 : vector<16x16xbf16> to vector<2x8x16xbf16>
    %175 = tpu.concatenate %172, %174 in 0 : vector<2x8x16xbf16>, vector<2x8x16xbf16> -> vector<4x8x16xbf16>
    %176 = vector.extract_strided_slice %169 {offsets = [0, 32], sizes = [16, 32], strides = [1, 1]} : vector<16x96xbf16> to vector<16x32xbf16>
    %177 = vector.extract_strided_slice %176 {offsets = [0, 0], sizes = [16, 16], strides = [1, 1]} : vector<16x32xbf16> to vector<16x16xbf16>
    %178 = vector.shape_cast %177 : vector<16x16xbf16> to vector<2x8x16xbf16>
    %179 = vector.extract_strided_slice %176 {offsets = [0, 16], sizes = [16, 16], strides = [1, 1]} : vector<16x32xbf16> to vector<16x16xbf16>
    %180 = vector.shape_cast %179 : vector<16x16xbf16> to vector<2x8x16xbf16>
    %181 = tpu.concatenate %178, %180 in 0 : vector<2x8x16xbf16>, vector<2x8x16xbf16> -> vector<4x8x16xbf16>
    %182 = vector.extract_strided_slice %169 {offsets = [0, 64], sizes = [16, 32], strides = [1, 1]} : vector<16x96xbf16> to vector<16x32xbf16>
    %183 = vector.extract_strided_slice %182 {offsets = [0, 0], sizes = [16, 16], strides = [1, 1]} : vector<16x32xbf16> to vector<16x16xbf16>
    %184 = vector.shape_cast %183 : vector<16x16xbf16> to vector<2x8x16xbf16>
    %185 = vector.extract_strided_slice %182 {offsets = [0, 16], sizes = [16, 16], strides = [1, 1]} : vector<16x32xbf16> to vector<16x16xbf16>
    %186 = vector.shape_cast %185 : vector<16x16xbf16> to vector<2x8x16xbf16>
    %187 = tpu.concatenate %184, %186 in 0 : vector<2x8x16xbf16>, vector<2x8x16xbf16> -> vector<4x8x16xbf16>
    "tpu.trace_start"() <{level = 10 : i32, message = "nqd,nkd->nqk"}> : () -> ()
    %cst_52 = arith.constant dense<0.000000e+00> : vector<4x8x8xf32>
    %188 = tpu.matmul %175, %181, %cst_52 {dimension_numbers = #tpu.dot_dimension_numbers<[2], [2], [1], [1], [0, 0, 0, 1, 1, 1], [0], [0]>} : vector<4x8x16xbf16>, vector<4x8x16xbf16>, vector<4x8x8xf32> -> vector<4x8x8xf32>
    "tpu.trace_stop"() : () -> ()
    %189 = vector.broadcast %27 : vector<4x1x8xf32> to vector<4x8x8xf32>
    %190 = arith.addf %188, %189 : vector<4x8x8xf32>
    %cst_53 = arith.constant dense<0xFF800000> : vector<4x8xf32>
    %191 = vector.multi_reduction <maximumf>, %190, %cst_53 [2] : vector<4x8x8xf32> to vector<4x8xf32>
    %192 = vector.shape_cast %191 : vector<4x8xf32> to vector<4x8x1xf32>
    %193 = vector.broadcast %192 : vector<4x8x1xf32> to vector<4x8x8xf32>
    %194 = arith.subf %190, %193 : vector<4x8x8xf32>
    %195 = math.exp %194 : vector<4x8x8xf32>
    %cst_54 = arith.constant dense<0.000000e+00> : vector<4x8xf32>
    %196 = vector.multi_reduction <add>, %195, %cst_54 [2] : vector<4x8x8xf32> to vector<4x8xf32>
    %197 = vector.shape_cast %196 : vector<4x8xf32> to vector<4x8x1xf32>
    %198 = tpu.reciprocal %197 : vector<4x8x1xf32> -> vector<4x8x1xf32>
    %199 = vector.broadcast %198 : vector<4x8x1xf32> to vector<4x8x8xf32>
    %200 = arith.mulf %195, %199 : vector<4x8x8xf32>
    %201 = arith.truncf %200 : vector<4x8x8xf32> to vector<4x8x8xbf16>
    "tpu.trace_start"() <{level = 10 : i32, message = "nqk,nkd->nqd"}> : () -> ()
    %cst_55 = arith.constant dense<0.000000e+00> : vector<4x8x16xf32>
    %202 = tpu.matmul %201, %187, %cst_55 {dimension_numbers = #tpu.dot_dimension_numbers<[2], [1], [1], [2], [0, 0, 0, 1, 1, 2], [0], [0]>} : vector<4x8x8xbf16>, vector<4x8x16xbf16>, vector<4x8x16xf32> -> vector<4x8x16xf32>
    "tpu.trace_stop"() : () -> ()
    %203 = vector.extract_strided_slice %202 {offsets = [0, 0, 0], sizes = [2, 8, 16], strides = [1, 1, 1]} : vector<4x8x16xf32> to vector<2x8x16xf32>
    %204 = vector.shape_cast %203 : vector<2x8x16xf32> to vector<16x16xf32>
    %205 = vector.extract_strided_slice %202 {offsets = [2, 0, 0], sizes = [2, 8, 16], strides = [1, 1, 1]} : vector<4x8x16xf32> to vector<2x8x16xf32>
    %206 = vector.shape_cast %205 : vector<2x8x16xf32> to vector<16x16xf32>
    %207 = tpu.concatenate %204, %206 in 1 : vector<16x16xf32>, vector<16x16xf32> -> vector<16x32xf32>
    %208 = arith.truncf %207 : vector<16x32xf32> to vector<16x32xbf16>
    %c1_56 = arith.constant 1 : index
    %c0_57 = arith.constant 0 : index
    %c0_58 = arith.constant 0 : index
    %209 = vector.load %arg3[%c1_56, %c0_57, %c0_58] : memref<2x32x32xbf16, #tpu.memory_space<vmem>>, vector<1x32x32xbf16>
    %210 = vector.shape_cast %209 : vector<1x32x32xbf16> to vector<32x32xbf16>
    %cst_59 = arith.constant dense<0.000000e+00> : vector<16x32xf32>
    %211 = tpu.matmul %208, %210, %cst_59 {dimension_numbers = #tpu.dot_dimension_numbers<[1], [0], [0], [1], [0, 0, 1, 1], [], []>} : vector<16x32xbf16>, vector<32x32xbf16>, vector<16x32xf32> -> vector<16x32xf32>
    %212 = vector.extract_strided_slice %161 {offsets = [1, 0], sizes = [1, 32], strides = [1, 1]} : vector<8x128xf32> to vector<1x32xf32>
    %213 = vector.broadcast %212 : vector<1x32xf32> to vector<16x32xf32>
    %214 = arith.addf %211, %213 : vector<16x32xf32>
    %215 = arith.addf %159, %214 : vector<16x32xf32>
    %216 = vector.extract_strided_slice %161 {offsets = [2, 0], sizes = [1, 32], strides = [1, 1]} : vector<8x128xf32> to vector<1x32xf32>
    %217 = vector.extract_strided_slice %161 {offsets = [3, 0], sizes = [1, 32], strides = [1, 1]} : vector<8x128xf32> to vector<1x32xf32>
    %cst_60 = arith.constant dense<0.000000e+00> : vector<16xf32>
    %218 = vector.multi_reduction <add>, %215, %cst_60 [1] : vector<16x32xf32> to vector<16xf32>
    %219 = vector.shape_cast %218 : vector<16xf32> to vector<16x1xf32>
    %cst_61 = arith.constant 3.200000e+01 : f32
    %220 = vector.broadcast %cst_61 : f32 to vector<16x1xf32>
    %221 = arith.divf %219, %220 : vector<16x1xf32>
    %222 = vector.broadcast %221 : vector<16x1xf32> to vector<16x32xf32>
    %223 = arith.subf %215, %222 : vector<16x32xf32>
    %224 = arith.mulf %223, %223 : vector<16x32xf32>
    %cst_62 = arith.constant dense<0.000000e+00> : vector<16xf32>
    %225 = vector.multi_reduction <add>, %224, %cst_62 [1] : vector<16x32xf32> to vector<16xf32>
    %226 = vector.shape_cast %225 : vector<16xf32> to vector<16x1xf32>
    %cst_63 = arith.constant 3.200000e+01 : f32
    %227 = vector.broadcast %cst_63 : f32 to vector<16x1xf32>
    %228 = arith.divf %226, %227 : vector<16x1xf32>
    %229 = vector.broadcast %221 : vector<16x1xf32> to vector<16x32xf32>
    %230 = arith.subf %215, %229 : vector<16x32xf32>
    %cst_64 = arith.constant 9.99999996E-13 : f32
    %231 = vector.broadcast %cst_64 : f32 to vector<16x1xf32>
    %232 = arith.addf %228, %231 : vector<16x1xf32>
    %233 = math.rsqrt %232 : vector<16x1xf32>
    %234 = vector.broadcast %233 : vector<16x1xf32> to vector<16x32xf32>
    %235 = arith.mulf %230, %234 : vector<16x32xf32>
    %236 = vector.broadcast %216 : vector<1x32xf32> to vector<16x32xf32>
    %237 = arith.mulf %235, %236 : vector<16x32xf32>
    %238 = vector.broadcast %217 : vector<1x32xf32> to vector<16x32xf32>
    %239 = arith.addf %237, %238 : vector<16x32xf32>
    %240 = arith.truncf %239 : vector<16x32xf32> to vector<16x32xbf16>
    %c1_65 = arith.constant 1 : index
    %c0_66 = arith.constant 0 : index
    %c0_67 = arith.constant 0 : index
    %241 = vector.load %arg4[%c1_65, %c0_66, %c0_67] : memref<2x32x128xbf16, #tpu.memory_space<vmem>>, vector<1x32x128xbf16>
    %242 = vector.shape_cast %241 : vector<1x32x128xbf16> to vector<32x128xbf16>
    %cst_68 = arith.constant dense<0.000000e+00> : vector<16x128xf32>
    %243 = tpu.matmul %240, %242, %cst_68 {dimension_numbers = #tpu.dot_dimension_numbers<[1], [0], [0], [1], [0, 0, 1, 1], [], []>} : vector<16x32xbf16>, vector<32x128xbf16>, vector<16x128xf32> -> vector<16x128xf32>
    %244 = vector.extract_strided_slice %161 {offsets = [4, 0], sizes = [1, 128], strides = [1, 1]} : vector<8x128xf32> to vector<1x128xf32>
    %245 = vector.broadcast %244 : vector<1x128xf32> to vector<16x128xf32>
    %246 = arith.addf %243, %245 : vector<16x128xf32>
    %247 = arith.mulf %246, %246 : vector<16x128xf32>
    %248 = arith.mulf %246, %247 : vector<16x128xf32>
    %cst_69 = arith.constant 4.471500e-02 : f32
    %249 = vector.broadcast %cst_69 : f32 to vector<16x128xf32>
    %250 = arith.mulf %249, %248 : vector<16x128xf32>
    %251 = arith.addf %246, %250 : vector<16x128xf32>
    %cst_70 = arith.constant 0.797884583 : f32
    %252 = vector.broadcast %cst_70 : f32 to vector<16x128xf32>
    %253 = arith.mulf %252, %251 : vector<16x128xf32>
    %254 = math.tanh %253 : vector<16x128xf32>
    %cst_71 = arith.constant 1.000000e+00 : f32
    %255 = vector.broadcast %cst_71 : f32 to vector<16x128xf32>
    %256 = arith.addf %255, %254 : vector<16x128xf32>
    %cst_72 = arith.constant 5.000000e-01 : f32
    %257 = vector.broadcast %cst_72 : f32 to vector<16x128xf32>
    %258 = arith.mulf %257, %256 : vector<16x128xf32>
    %259 = arith.mulf %246, %258 : vector<16x128xf32>
    %260 = arith.truncf %259 : vector<16x128xf32> to vector<16x128xbf16>
    %c1_73 = arith.constant 1 : index
    %c0_74 = arith.constant 0 : index
    %c0_75 = arith.constant 0 : index
    %261 = vector.load %arg5[%c1_73, %c0_74, %c0_75] : memref<2x128x32xbf16, #tpu.memory_space<vmem>>, vector<1x128x32xbf16>
    %262 = vector.shape_cast %261 : vector<1x128x32xbf16> to vector<128x32xbf16>
    %cst_76 = arith.constant dense<0.000000e+00> : vector<16x32xf32>
    %263 = tpu.matmul %260, %262, %cst_76 {dimension_numbers = #tpu.dot_dimension_numbers<[1], [0], [0], [1], [0, 0, 1, 1], [], []>} : vector<16x128xbf16>, vector<128x32xbf16>, vector<16x32xf32> -> vector<16x32xf32>
    %264 = vector.extract_strided_slice %161 {offsets = [5, 0], sizes = [1, 32], strides = [1, 1]} : vector<8x128xf32> to vector<1x32xf32>
    %265 = vector.broadcast %264 : vector<1x32xf32> to vector<16x32xf32>
    %266 = arith.addf %263, %265 : vector<16x32xf32>
    %267 = arith.addf %239, %266 : vector<16x32xf32>
    %268 = vector.extract_strided_slice %161 {offsets = [6, 0], sizes = [1, 32], strides = [1, 1]} : vector<8x128xf32> to vector<1x32xf32>
    %269 = vector.extract_strided_slice %161 {offsets = [7, 0], sizes = [1, 32], strides = [1, 1]} : vector<8x128xf32> to vector<1x32xf32>
    %cst_77 = arith.constant dense<0.000000e+00> : vector<16xf32>
    %270 = vector.multi_reduction <add>, %267, %cst_77 [1] : vector<16x32xf32> to vector<16xf32>
    %271 = vector.shape_cast %270 : vector<16xf32> to vector<16x1xf32>
    %cst_78 = arith.constant 3.200000e+01 : f32
    %272 = vector.broadcast %cst_78 : f32 to vector<16x1xf32>
    %273 = arith.divf %271, %272 : vector<16x1xf32>
    %274 = vector.broadcast %273 : vector<16x1xf32> to vector<16x32xf32>
    %275 = arith.subf %267, %274 : vector<16x32xf32>
    %276 = arith.mulf %275, %275 : vector<16x32xf32>
    %cst_79 = arith.constant dense<0.000000e+00> : vector<16xf32>
    %277 = vector.multi_reduction <add>, %276, %cst_79 [1] : vector<16x32xf32> to vector<16xf32>
    %278 = vector.shape_cast %277 : vector<16xf32> to vector<16x1xf32>
    %cst_80 = arith.constant 3.200000e+01 : f32
    %279 = vector.broadcast %cst_80 : f32 to vector<16x1xf32>
    %280 = arith.divf %278, %279 : vector<16x1xf32>
    %281 = vector.broadcast %273 : vector<16x1xf32> to vector<16x32xf32>
    %282 = arith.subf %267, %281 : vector<16x32xf32>
    %cst_81 = arith.constant 9.99999996E-13 : f32
    %283 = vector.broadcast %cst_81 : f32 to vector<16x1xf32>
    %284 = arith.addf %280, %283 : vector<16x1xf32>
    %285 = math.rsqrt %284 : vector<16x1xf32>
    %286 = vector.broadcast %285 : vector<16x1xf32> to vector<16x32xf32>
    %287 = arith.mulf %282, %286 : vector<16x32xf32>
    %288 = vector.broadcast %268 : vector<1x32xf32> to vector<16x32xf32>
    %289 = arith.mulf %287, %288 : vector<16x32xf32>
    %290 = vector.broadcast %269 : vector<1x32xf32> to vector<16x32xf32>
    %291 = arith.addf %289, %290 : vector<16x32xf32>
    %292 = vector.extract_strided_slice %291 {offsets = [0, 0], sizes = [1, 32], strides = [1, 1]} : vector<16x32xf32> to vector<1x32xf32>
    %293 = vector.extract_strided_slice %291 {offsets = [8, 0], sizes = [1, 32], strides = [1, 1]} : vector<16x32xf32> to vector<1x32xf32>
    %294 = tpu.concatenate %292, %293 in 0 : vector<1x32xf32>, vector<1x32xf32> -> vector<2x32xf32>
    %295 = arith.truncf %294 : vector<2x32xf32> to vector<2x32xbf16>
    %c0_82 = arith.constant 0 : index
    %c0_83 = arith.constant 0 : index
    %296 = vector.load %arg7[%c0_82, %c0_83] : memref<32x512xbf16, #tpu.memory_space<vmem>>, vector<32x512xbf16>
    %cst_84 = arith.constant dense<0.000000e+00> : vector<2x512xf32>
    %297 = tpu.matmul %295, %296, %cst_84 {dimension_numbers = #tpu.dot_dimension_numbers<[1], [0], [0], [1], [0, 0, 1, 1], [], []>} : vector<2x32xbf16>, vector<32x512xbf16>, vector<2x512xf32> -> vector<2x512xf32>
    %298 = vector.extract_strided_slice %0 {offsets = [0, 0], sizes = [1, 512], strides = [1, 1]} : vector<8x512xf32> to vector<1x512xf32>
    %299 = vector.broadcast %298 : vector<1x512xf32> to vector<2x512xf32>
    %300 = arith.addf %297, %299 : vector<2x512xf32>
    %cst_85 = arith.constant 0.000000e+00 : f32
    %301 = vector.broadcast %cst_85 : f32 to vector<2x512xf32>
    %302 = arith.maximumf %300, %301 : vector<2x512xf32>
    %303 = arith.truncf %302 : vector<2x512xf32> to vector<2x512xbf16>
    %c0_86 = arith.constant 0 : index
    %c0_87 = arith.constant 0 : index
    %304 = vector.load %arg8[%c0_86, %c0_87] : memref<512x512xbf16, #tpu.memory_space<vmem>>, vector<512x512xbf16>
    %cst_88 = arith.constant dense<0.000000e+00> : vector<2x512xf32>
    %305 = tpu.matmul %303, %304, %cst_88 {dimension_numbers = #tpu.dot_dimension_numbers<[1], [0], [0], [1], [0, 0, 1, 1], [], []>} : vector<2x512xbf16>, vector<512x512xbf16>, vector<2x512xf32> -> vector<2x512xf32>
    %306 = vector.extract_strided_slice %0 {offsets = [1, 0], sizes = [1, 512], strides = [1, 1]} : vector<8x512xf32> to vector<1x512xf32>
    %307 = vector.broadcast %306 : vector<1x512xf32> to vector<2x512xf32>
    %308 = arith.addf %305, %307 : vector<2x512xf32>
    %cst_89 = arith.constant 0.000000e+00 : f32
    %309 = vector.broadcast %cst_89 : f32 to vector<2x512xf32>
    %310 = arith.maximumf %308, %309 : vector<2x512xf32>
    %311 = arith.truncf %310 : vector<2x512xf32> to vector<2x512xbf16>
    %c0_90 = arith.constant 0 : index
    %c0_91 = arith.constant 0 : index
    %312 = vector.load %arg9[%c0_90, %c0_91] : memref<512x128xbf16, #tpu.memory_space<vmem>>, vector<512x128xbf16>
    %cst_92 = arith.constant dense<0.000000e+00> : vector<2x128xf32>
    %313 = tpu.matmul %311, %312, %cst_92 {dimension_numbers = #tpu.dot_dimension_numbers<[1], [0], [0], [1], [0, 0, 1, 1], [], []>} : vector<2x512xbf16>, vector<512x128xbf16>, vector<2x128xf32> -> vector<2x128xf32>
    %314 = vector.extract_strided_slice %0 {offsets = [2, 0], sizes = [1, 128], strides = [1, 1]} : vector<8x512xf32> to vector<1x128xf32>
    %315 = vector.broadcast %314 : vector<1x128xf32> to vector<2x128xf32>
    %316 = arith.addf %313, %315 : vector<2x128xf32>
    %317 = vector.extract_strided_slice %316 {offsets = [0, 0], sizes = [2, 8], strides = [1, 1]} : vector<2x128xf32> to vector<2x8xf32>
    %318 = vector.extract_strided_slice %0 {offsets = [3, 0], sizes = [2, 8], strides = [1, 1]} : vector<8x512xf32> to vector<2x8xf32>
    %cst_93 = arith.constant 0.000000e+00 : f32
    %319 = vector.broadcast %cst_93 : f32 to vector<2x8xf32>
    %320 = arith.maximumf %317, %319 : vector<2x8xf32>
    %321 = arith.mulf %317, %318 : vector<2x8xf32>
    %322 = arith.subf %320, %321 : vector<2x8xf32>
    %323 = math.absf %317 : vector<2x8xf32>
    %cst_94 = arith.constant 0.000000e+00 : f32
    %324 = vector.broadcast %cst_94 : f32 to vector<2x8xf32>
    %325 = arith.subf %324, %323 : vector<2x8xf32>
    %326 = math.exp %325 : vector<2x8xf32>
    %cst_95 = arith.constant 1.000000e+00 : f32
    %327 = vector.broadcast %cst_95 : f32 to vector<2x8xf32>
    %328 = arith.addf %327, %326 : vector<2x8xf32>
    %329 = math.log %328 : vector<2x8xf32>
    %330 = arith.addf %322, %329 : vector<2x8xf32>
    %331 = vector.extract_strided_slice %330 {offsets = [0, 0], sizes = [2, 5], strides = [1, 1]} : vector<2x8xf32> to vector<2x5xf32>
    %332 = vector.shape_cast %331 : vector<2x5xf32> to vector<1x2x5xf32>
    %cst_96 = arith.constant dense<0.000000e+00> : vector<1xf32>
    %333 = vector.multi_reduction <add>, %332, %cst_96 [1, 2] : vector<1x2x5xf32> to vector<1xf32>
    %334 = vector.shape_cast %333 : vector<1xf32> to vector<1x1x1xf32>
    %335 = vector.extract %334[0, 0, 0] : f32 from vector<1x1x1xf32>
    %336 = vector.broadcast %335 : f32 to vector<1x1xf32>
    %cst_97 = arith.constant 1.000000e-01 : f32
    %337 = vector.broadcast %cst_97 : f32 to vector<1x1xf32>
    %338 = arith.mulf %336, %337 : vector<1x1xf32>
    %339 = vector.extract_strided_slice %330 {offsets = [0, 5], sizes = [2, 3], strides = [1, 1]} : vector<2x8xf32> to vector<2x3xf32>
    %340 = vector.shape_cast %339 : vector<2x3xf32> to vector<1x2x3xf32>
    %cst_98 = arith.constant dense<0.000000e+00> : vector<1xf32>
    %341 = vector.multi_reduction <add>, %340, %cst_98 [1, 2] : vector<1x2x3xf32> to vector<1xf32>
    %342 = vector.shape_cast %341 : vector<1xf32> to vector<1x1x1xf32>
    %343 = vector.extract %342[0, 0, 0] : f32 from vector<1x1x1xf32>
    %344 = vector.broadcast %343 : f32 to vector<1x1xf32>
    %cst_99 = arith.constant 0.166666672 : f32
    %345 = vector.broadcast %cst_99 : f32 to vector<1x1xf32>
    %346 = arith.mulf %344, %345 : vector<1x1xf32>
    %cst_100 = arith.constant 1.000000e+00 : f32
    %347 = vector.broadcast %cst_100 : f32 to vector<1x1xf32>
    %348 = arith.mulf %347, %338 : vector<1x1xf32>
    %cst_101 = arith.constant 1.000000e+00 : f32
    %349 = vector.broadcast %cst_101 : f32 to vector<1x1xf32>
    %350 = arith.mulf %349, %346 : vector<1x1xf32>
    %351 = arith.addf %348, %350 : vector<1x1xf32>
    %cst_102 = arith.constant 0.000000e+00 : f32
    %352 = vector.broadcast %cst_102 : f32 to vector<1x125xf32>
    %353 = tpu.concatenate %338, %346, %351, %352 in 1 : vector<1x1xf32>, vector<1x1xf32>, vector<1x1xf32>, vector<1x125xf32> -> vector<1x128xf32>
    %354 = tpu.concatenate %316, %353 in 0 : vector<2x128xf32>, vector<1x128xf32> -> vector<3x128xf32>
    %c0_103 = arith.constant 0 : index
    %c0_104 = arith.constant 0 : index
    %355 = vector.load %arg11[%c0_103, %c0_104] : memref<3x128xf32, #tpu.memory_space<vmem>>, vector<3x128xf32>
    tpu.vector_store %arg11[%c0_103, %c0_104], %354 {strides = array<i32>} : memref<3x128xf32, #tpu.memory_space<vmem>>, vector<3x128xf32>,
    return
  }
}

</mosaic_0001>

<bundles_post_ra>
// kernel: forward.1
= control target key start
LH: loop header
LB: loop body
LE: loop exit
PB: predicated region body
PF: predicated region fallthrough
CT: control target
= control target key end

     0   :  { %16 = vsyncpa [#allocation3], 0  ;;  %s4342_s17 = smov [#allocation2]   ;;  %s5050_s0 = inlined_call_operand.vmem [shape: f32[16,32], index: 0, kind: input, shape index: {}]   ;;  %s5051_s1 = inlined_call_operand.vmem [shape: f32[4,8], index: 1, kind: input, shape index: {}]   ;;  %s5052_s2 = inlined_call_operand.vmem [shape: bf16[2,32,96], index: 2, kind: input, shape index: {}]   ;;  %s5053_s3 = inlined_call_operand.vmem [shape: bf16[2,32,32], index: 3, kind: input, shape index: {}]   ;;  %s5054_s4 = inlined_call_operand.vmem [shape: bf16[2,32,128], index: 4, kind: input, shape index: {}]   ;;  %s5055_s5 = inlined_call_operand.vmem [shape: bf16[2,128,32], index: 5, kind: input, shape index: {}]   ;;  %s5056_s6 = inlined_call_operand.vmem [shape: f32[2,8,128], index: 6, kind: input, shape index: {}]   ;;  %s5057_s7 = inlined_call_operand.vmem [shape: bf16[32,512], index: 7, kind: input, shape index: {}]   ;;  %s5058_s8 = inlined_call_operand.hbm [shape: bf16[512,512], index: 8, kind: input, shape index: {}]   ;;  %s5059_s9 = inlined_call_operand.vmem [shape: bf16[512,128], index: 9, kind: input, shape index: {}]   ;;  %s5060_s10 = inlined_call_operand.vmem [shape: f32[8,512], index: 10, kind: input, shape index: {}]   ;;  %s5061_s11 = inlined_call_operand.vmem [shape: f32[3,128], index: 11, kind: output, shape index: {}]  }
   0x1   :  { %s38_s18 = sshll.u32 %s4342_s17, 4  ;;  %s4318_s21 = scalar_lea.hbm %s5058_s8, 16384  ;;  %s39_s18 = int_to_ptr.vmem [resolvable:$true] %s38_s18 }
   0x2   :  { %p4319_p0 = scmp.ne.s32.totalorder %s5058_s8, %s4318_s21  ;;  %p4322_p1 = scmp.lt.u32.totalorder %s4318_s21, %s5058_s8 }
   0x4   :  { %p4324_p2 = pnand %p4322_p1, %p4319_p0 }
   0x6   :  { %4327 = shalt.err (!%p4324_p2)
}
   0x7   :  { %s4328_s26 = scalar_lea.vmem %s39_s18, 16384  ;;  %p4333_p4 = scmp.lt.s32.totalorder %s39_s18, %s39_s18 }
   0x8   :  { %p4329_p3 = scmp.ne.s32.totalorder %s39_s18, %s4328_s26  ;;  %p4334_p5 = scmp.lt.s32.totalorder %s4328_s26, %s4328_s26 }
   0xa   :  { %p4335_p6 = por %p4334_p5, %p4333_p4 }
   0xc   :  { %p4336_p7 = pnand %p4335_p6, %p4329_p3 }
   0xe   :  { %4339 = shalt.err (!%p4336_p7)
}
   0xf   :  { %s4343_s27 = smov 256   ;;  %s4344_s28 = smov 16  }
  0x10   :  { %44 = dma.hbm_to_vmem [thread:$0]  %s5058_s8, 16384, %s39_s18, [#allocation3], %s4343_s27, %s4343_s27, %s4344_s28  }
  0x11   :  { %4340 = dma.done.wait [#allocation3], 16384  }
  0x12   :  { %4341 = vsyncadd [#allocation3], 4294950912  ;;  %vm59_vm0 = vcmask 261120   ;;  %v57_v0 = vld [vmem:[%s5050_s0] sm:$0xff]  ;;  %v58_v1 = vld [vmem:[%s5050_s0 + $0x8] sm:$0xff]  ;;  %v4345_v15 = vmov 0.0   ;;  %v87_v21 = vlaneseq }
  0x13   :  { %v60_v2 = vsel %vm59_vm0, %v57_v0, 0.0  ;;  %v63_v3 = vsel %vm59_vm0, %v58_v1, 0.0  ;;  %v3989_v14 = vld [vmem:[%s5052_s2] sm:$0xff]   ;;  %3768 = vmatprep.subr.bf16.mxu1 %v4345_v15  ;;  %3782 = vmatprep.subr.bf16.mxu0 %v4345_v15  ;;  %v3990_v16 = vld [vmem:[%s5052_s2 + $0x8] sm:$0xff]   ;;  %vm4346_vm1 = vmmov 0   ;;  %s4347_s22 = smov 112  }
  0x14   :  { %61 = vadd.xlane.f32.xlu0 %v60_v2  ;;  %3769 = vmatpush3.bf16.msra.mxu1 %v3989_v14  ;;  %v4450_v24 = vshrl.u32 %v87_v21, 7  ;;  %v53_v26 = vld [vmem:[%s5060_s10] sm:$0xff]  ;;  %s4348_s23 = smov 96   ;;  %vm223_vm2 = vcmask 130048   ;;  %v4349_v62 = vmov 1966171168  }
  0x15   :  { %3772 = vmatprep.mubr.msk.bf16.mxu1 %vm4346_vm1, %v4345_v15  ;;  %3770 = vmatprep.subr.bf16.mxu1 %v4345_v15  ;;  %v4478_v40 = vld [vmem:[%s5056_s6] sm:$0xff]  ;;  %v110_v63 = vunpack.c.l.s4 %v4349_v62  ;;  %vm418_vm3 = vcmask 64512   ;;  %vm472_vm4 = vcmask 1043456   ;;  %vm1876_vm5 = vcmask 1040384  }
  0x16   :  { %3784 = vmatprep.mubr.msk.bf16.mxu0 %vm4346_vm1, %v4345_v15  ;;  %v4453_v25 = vsub.s32 5, %v4450_v24  ;;  %v4460_v30 = vsub.s32 6, %v4450_v24  ;;  %v4473_v39 = vsub.s32 0, %v4450_v24  ;;  %vm3346_vm6 = vcmask 33792  }
  0x17   :  { %v3394_v2 = vld.sshfl [vmem:[%s5051_s1] sm:$0x33 pattern:$0x75316420]  ;;  %s4350_s1 = smov 64   ;;  %vm3363_vm7 = vcmask 17408  }
  0x18   :  { %64 = vadd.xlane.f32.xlu0 %v63_v3  ;;  %3771 = vmatpush3.bf16.msra.mxu1 %v3990_v16  ;;  %v90_v29 = vrot.slane %v53_v26, %v4453_v25  ;;  %v96_v34 = vrot.slane %v53_v26, %v4460_v30  ;;  %v134_v41 = vrot.slane %v4478_v40, %v4473_v39  ;;  %vm3377_vm8 = vcmask 7168  }
  0x19   :  { %3776 = vmatprep.subr.bf16.mxu1 %v4345_v15  ;;  %vm3379_vm9 = vcmask 15360   ;;  %vm3381_vm10 = vcmask 23552   ;;  %vm3386_vm11 = vcmask 1041408  }
  0xa1   :  { %v62_v4 = vpop.xlane.xlu0 %61 }
  0xa2   :  { %v67_v5 = vmul.f32 0.03125, %v62_v4  ;;  %v108_v4 = vcombine.high %v3394_v2, %v3394_v2 }
  0xa4   :  { %v69_v6 = vsub.f32 %v57_v0, %v67_v5  ;;  %v111_v0 = vunpack.c.0.s8 %v110_v63 }
  0xa5   :  { %v65_v7 = vpop.xlane.xlu0 %64 }
  0xa6   :  { %v68_v8 = vmul.f32 0.03125, %v65_v7  ;;  %v71_v9 = vmul.f32 %v69_v6, %v69_v6 }
  0xa8   :  { %v70_v10 = vsub.f32 %v58_v1, %v68_v8  ;;  %v73_v11 = vsel %vm59_vm0, %v71_v9, 0.0  ;;  %v114_v1 = vsub.s32 %v111_v0, %v4450_v24 }
  0xa9   :  { %74 = vadd.xlane.f32.xlu1 %v73_v11 }
  0xaa   :  { %v72_v12 = vmul.f32 %v70_v10, %v70_v10  ;;  %v115_v3 = vrot.slane %v3394_v2, %v114_v1 }
  0xac   :  { %v76_v13 = vsel %vm59_vm0, %v72_v12, 0.0  ;;  %v4529_v5 = vrot.slane %v115_v3, %v4473_v39  ;;  %v123_v21 = vcombine.high %v115_v3, %v115_v3 }
  0xad   :  { %77 = vadd.xlane.f32.xlu1 %v76_v13 }
 0x136   :  { %v75_v17 = vpop.xlane.xlu1 %74 }
 0x137   :  { %v79_v18 = vmul.f32 0.03125, %v75_v17 }
 0x139   :  { %v81_v19 = vadd.f32 1e-12, %v79_v18 }
 0x13a   :  { %v78_v20 = vpop.xlane.xlu1 %77 }
 0x13b   :  { %4253 = vrsqrt.f32 %v81_v19  ;;  %v80_v22 = vmul.f32 0.03125, %v78_v20 }
 0x13d   :  { %v82_v23 = vadd.f32 1e-12, %v80_v22 }
 0x13f   :  { %4255 = vrsqrt.f32 %v82_v23  ;;  %v4539_v23 = vrot.slane %v123_v21, %v4473_v39 }
 0x145   :  { %v4254_v27 = vpop.eup %4253 }
 0x146   :  { %v85_v28 = vmul.f32 %v4254_v27, %v69_v6  ;;  %v122_v6 = vrot.slane %v108_v4, %v114_v1 }
 0x148   :  { %v91_v33 = vmul.f32 %v90_v29, %v85_v28  ;;  %v124_v22 = vcombine.high %v122_v6, %v122_v6 }
 0x149   :  { %v4256_v31 = vpop.eup %4255 }
 0x14a   :  { %v86_v32 = vmul.f32 %v4256_v31, %v70_v10  ;;  %v4463_v36 = vadd.f32 %v96_v34, %v91_v33  ;;  %v4533_v10 = vrot.slane %v122_v6, %v4473_v39  ;;  %v4542_v26 = vrot.slane %v124_v22, %v4473_v39 }
 0x14c   :  { %v92_v35 = vmul.f32 %v90_v29, %v86_v32 }
 0x14e   :  { %v4465_v37 = vadd.f32 %v96_v34, %v92_v35 }
 0x150   :  { %v126_v38 = vpack.c.bf16 %v4465_v37, %v4463_v36 }
 0x152   :  { %3773 = vmatmul.mubr.msk.bf16.vlgmr.msra.gmra.mrb[0].mxu1 %vm59_vm0, %v126_v38 }
 0x153   :  { %3778 = vmatprep.mubr.msk.bf16.mxu1 %vm4346_vm1, %v4345_v15 }
 0x225   :  { %v184_v42 = vpop.f32.mrb[0].mxu1 }
 0x226   :  { %v185_v43 = vadd.f32 %v184_v42, %v134_v41  ;;  %v3774_v44 = vpop.f32.mrb[1].mxu1 }
 0x227   :  { %v187_v45 = vpop.f32.mrb[2].mxu1 }
 0x228   :  { %v4482_v46 = vpack.c.bf16 %v185_v43, %v185_v43  ;;  %v188_v47 = vadd.f32 %v187_v45, %v134_v41  ;;  %v3775_v48 = vpop.f32.mrb[3].mxu1 }
 0x22a   :  { %v4484_v49 = vpack.c.bf16 %v188_v47, %v188_v47  ;;  %197 = vrot.lane.b32.xlu0 %v4482_v46, %s4347_s22 }
 0x22c   :  { %199 = vrot.lane.b32.xlu1 %v4484_v49, %s4347_s22 }
 0x230   :  { %221 = vrot.lane.b32.xlu1 %v4482_v46, %s4348_s23 }
 0x234   :  { %270 = vrot.lane.b32.xlu1 %v4484_v49, %s4348_s23 }
 0x29c   :  { %v198_v50 = vpop.permute.xlu0 %197 }
 0x29d   :  { %v4494_v51 = vcombine.low %v198_v50, %v198_v50 }
 0x29e   :  { %v200_v52 = vpop.permute.xlu1 %199 }
 0x29f   :  { %v4496_v53 = vcombine.low %v200_v52, %v200_v52  ;;  %320 = vrot.lane.b32.xlu0 %v4494_v51, %s4348_s23 }
 0x2a1   :  { %370 = vrot.lane.b32.xlu1 %v4496_v53, %s4348_s23 }
 0x2a2   :  { %v222_v54 = vpop.permute.xlu1 %221 }
 0x2a3   :  { %v228_v55 = vsel %vm223_vm2, %v222_v54, 0 }
 0x2a4   :  { %3777 = vmatpush3.bf16.xpose.msra.mxu1 %v228_v55 }
 0x2a5   :  { %3788 = vmatprep.subr.bf16.mxu1 %v4345_v15 }
 0x2a6   :  { %v271_v56 = vpop.permute.xlu1 %270 }
 0x2a7   :  { %v276_v57 = vsel %vm223_vm2, %v271_v56, 0 }
 0x2a8   :  { %3783 = vmatpush3.bf16.xpose.msra.mxu0 %v276_v57 }
 0x2a9   :  { %3794 = vmatprep.subr.bf16.mxu0 %v4345_v15 }
 0x2ab   :  { %3779 = vmatmul.mubr.msk.bf16.vlgmr.msra.gmra.mrb[4].mxu1 %vm223_vm2, %v4482_v46 }
 0x2ac   :  { %3790 = vmatprep.mubr.msk.bf16.mxu1 %vm4346_vm1, %v4345_v15 }
 0x2af   :  { %3785 = vmatmul.mubr.msk.bf16.vlgmr.msra.gmra.mrb[0].mxu0 %vm223_vm2, %v4484_v49 }
 0x2b0   :  { %3796 = vmatprep.mubr.msk.bf16.mxu0 %vm4346_vm1, %v4345_v15 }
 0x311   :  { %v321_v58 = vpop.permute.xlu0 %320 }
 0x312   :  { %v326_v59 = vsel %vm223_vm2, %v321_v58, 0 }
 0x313   :  { %3789 = vmatpush3.bf16.xpose.msra.mxu1 %v326_v59  ;;  %v371_v60 = vpop.permute.xlu1 %370 }
 0x314   :  { %v376_v61 = vsel %vm223_vm2, %v371_v60, 0  ;;  %3800 = vmatprep.subr.bf16.mxu1 %v4345_v15 }
 0x315   :  { %3795 = vmatpush3.bf16.xpose.msra.mxu0 %v376_v61 }
 0x316   :  { %3806 = vmatprep.subr.bf16.mxu0 %v4345_v15 }
 0x31a   :  { %3791 = vmatmul.mubr.msk.bf16.vlgmr.msra.gmra.mrb[8].mxu1 %vm223_vm2, %v198_v50 }
 0x31b   :  { %3802 = vmatprep.mubr.msk.bf16.mxu1 %vm4346_vm1, %v4345_v15 }
 0x31c   :  { %3797 = vmatmul.mubr.msk.bf16.vlgmr.msra.gmra.mrb[4].mxu0 %vm223_vm2, %v200_v52 }
 0x31d   :  { %3808 = vmatprep.mubr.msk.bf16.mxu0 %vm4346_vm1, %v4345_v15 }
 0x37e   :  { %v264_v7 = vpop.f32.mrb[4].mxu1 }
 0x37f   :  { %v265_v8 = vadd.f32 %v264_v7, %v4529_v5  ;;  %v3780_v9 = vpop.f32.mrb[5].mxu1 }
 0x380   :  { %v267_v11 = vpop.f32.mrb[6].mxu1 }
 0x381   :  { %v3781_v12 = vpop.f32.mrb[7].mxu1  ;;  %v419_v13 = vsel %vm418_vm3, %v265_v8, -inf }
 0x382   :  { %v312_v14 = vpop.f32.mrb[0].mxu0  ;;  %420 = vmax.xlane.f32.xlu0 %v419_v13 }
 0x383   :  { %v313_v16 = vadd.f32 %v312_v14, %v4533_v10  ;;  %v3786_v17 = vpop.f32.mrb[1].mxu0 }
 0x384   :  { %v315_v18 = vpop.f32.mrb[2].mxu0 }
 0x385   :  { %v3787_v19 = vpop.f32.mrb[3].mxu0  ;;  %v422_v20 = vsel %vm418_vm3, %v313_v16, -inf }
 0x386   :  { %423 = vmax.xlane.f32.xlu1 %v422_v20 }
 0x3ed   :  { %v362_v27 = vpop.f32.mrb[8].mxu1 }
 0x3ee   :  { %v363_v28 = vadd.f32 %v362_v27, %v4539_v23  ;;  %v3792_v29 = vpop.f32.mrb[9].mxu1 }
 0x3ef   :  { %v365_v31 = vpop.f32.mrb[10].mxu1  ;;  %v412_v32 = vpop.f32.mrb[4].mxu0 }
 0x3f0   :  { %v413_v33 = vadd.f32 %v412_v32, %v4542_v26  ;;  %v3793_v34 = vpop.f32.mrb[11].mxu1  ;;  %v3798_v35 = vpop.f32.mrb[5].mxu0  ;;  %v425_v38 = vsel %vm418_vm3, %v363_v28, -inf  ;;  %v3991_v32 = vld [vmem:[%s5053_s3] sm:$0xff]  }
 0x3f1   :  { %v415_v41 = vpop.f32.mrb[6].mxu0  ;;  %426 = vmax.xlane.f32.xlu0 %v425_v38 }
 0x3f2   :  { %v3799_v42 = vpop.f32.mrb[7].mxu0  ;;  %v428_v43 = vsel %vm418_vm3, %v413_v33, -inf }
 0x3f5   :  { %429 = vmax.xlane.f32.xlu0 %v428_v43  ;;  %v3992_v43 = vld [vmem:[%s5053_s3 + $0x8] sm:$0xff]  }
 0x40f   :  { %v421_v44 = vpop.xlane.xlu0 %420 }
 0x410   :  { %v431_v45 = vsub.f32 %v265_v8, %v421_v44 }
 0x412   :  { %v435_v47 = vmul.f32 1.442695, %v431_v45 }
 0x413   :  { %v424_v48 = vpop.xlane.xlu1 %423 }
 0x414   :  { %4257 = vpow2.f32 %v435_v47  ;;  %v432_v50 = vsub.f32 %v313_v16, %v424_v48 }
 0x416   :  { %v437_v52 = vmul.f32 1.442695, %v432_v50 }
 0x418   :  { %4259 = vpow2.f32 %v437_v52 }
 0x41e   :  { %v4258_v54 = vpop.eup %4257 }
 0x41f   :  { %v443_v55 = vsel %vm418_vm3, %v4258_v54, 0.0 }
 0x420   :  { %444 = vadd.xlane.f32.xlu0 %v443_v55 }
 0x422   :  { %v4260_v56 = vpop.eup %4259 }
 0x423   :  { %v446_v57 = vsel %vm418_vm3, %v4260_v56, 0.0 }
 0x424   :  { %447 = vadd.xlane.f32.xlu1 %v446_v57 }
 0x435   :  { %516 = vrot.lane.b32.xlu1 %v4484_v49, %s4350_s1 }
 0x439   :  { %564 = vrot.lane.b32.xlu1 %v4494_v51, %s4350_s1 }
 0x47e   :  { %v427_v58 = vpop.xlane.xlu0 %426 }
 0x47f   :  { %v433_v59 = vsub.f32 %v363_v28, %v427_v58 }
 0x481   :  { %v439_v60 = vmul.f32 1.442695, %v433_v59 }
 0x482   :  { %v430_v61 = vpop.xlane.xlu0 %429 }
 0x483   :  { %4261 = vpow2.f32 %v439_v60  ;;  %v434_v62 = vsub.f32 %v413_v33, %v430_v61 }
 0x485   :  { %v441_v63 = vmul.f32 1.442695, %v434_v62 }
 0x487   :  { %4263 = vpow2.f32 %v441_v63 }
 0x48d   :  { %v4262_v0 = vpop.eup %4261 }
 0x48e   :  { %v449_v1 = vsel %vm418_vm3, %v4262_v0, 0.0 }
 0x48f   :  { %450 = vadd.xlane.f32.xlu0 %v449_v1  ;;  %v4595_v1 = vsub.s32 1, %v4450_v24 }
 0x491   :  { %v4264_v2 = vpop.eup %4263 }
 0x492   :  { %v452_v3 = vsel %vm418_vm3, %v4264_v2, 0.0 }
 0x493   :  { %453 = vadd.xlane.f32.xlu1 %v452_v3 }
 0x4a4   :  { %612 = vrot.lane.b32.xlu1 %v4496_v53, %s4350_s1 }
 0x4a5   :  { %467 = vrot.lane.b32.xlu0 %v4482_v46, %s4350_s1 }
 0x4ad   :  { %v445_v53 = vpop.xlane.xlu0 %444 }
 0x4b1   :  { %v448_v49 = vpop.xlane.xlu1 %447 }
 0x4b2   :  { %4265 = vrcp.f32 %v448_v49 }
 0x4b3   :  { %4267 = vrcp.f32 %v445_v53 }
 0x4b5   :  { %v517_v51 = vpop.permute.xlu1 %516 }
 0x4b6   :  { %v522_v4 = vsel %vm472_vm4, %v517_v51, 0 }
 0x4b7   :  { %3807 = vmatpush3.bf16.msra.mxu0 %v522_v4 }
 0x4b8   :  { %3818 = vmatprep.subr.bf16.mxu0 %v4345_v15 }
 0x4b9   :  { %v565_v9 = vpop.permute.xlu1 %564 }
 0x4ba   :  { %v570_v19 = vsel %vm472_vm4, %v565_v9, 0 }
 0x4bc   :  { %v4266_v6 = vpop.eup %4265 }
 0x4bd   :  { %v460_v7 = vmul.f32 %v4266_v6, %v4260_v56  ;;  %v4268_v46 = vpop.eup %4267 }
 0x4be   :  { %v459_v12 = vmul.f32 %v4268_v46, %v4258_v54 }
 0x4bf   :  { %v464_v8 = vpack.c.bf16 %v460_v7, %v460_v7 }
 0x4c0   :  { %v463_v17 = vpack.c.bf16 %v459_v12, %v459_v12 }
 0x4c1   :  { %3809 = vmatmul.mubr.msk.bf16.vlgmr.msra.gmra.mrb[8].mxu0 %vm418_vm3, %v464_v8 }
 0x4c2   :  { %3820 = vmatprep.mubr.msk.bf16.mxu0 %vm4346_vm1, %v4345_v15 }
 0x51c   :  { %v451_v11 = vpop.xlane.xlu0 %450 }
 0x51d   :  { %4269 = vrcp.f32 %v451_v11 }
 0x520   :  { %v454_v13 = vpop.xlane.xlu1 %453  ;;  %v468_v14 = vpop.permute.xlu0 %467 }
 0x521   :  { %4271 = vrcp.f32 %v454_v13  ;;  %v474_v16 = vsel %vm472_vm4, %v468_v14, 0 }
 0x522   :  { %3801 = vmatpush3.bf16.msra.mxu1 %v474_v16 }
 0x523   :  { %3812 = vmatprep.subr.bf16.mxu1 %v4345_v15 }
 0x524   :  { %v613_v18 = vpop.permute.xlu1 %612 }
 0x525   :  { %v618_v20 = vsel %vm472_vm4, %v613_v18, 0  ;;  %3803 = vmatmul.mubr.msk.bf16.vlgmr.msra.gmra.mrb[12].mxu1 %vm418_vm3, %v463_v17 }
 0x526   :  { %3813 = vmatpush3.bf16.msra.mxu1 %v570_v19  ;;  %3819 = vmatpush3.bf16.msra.mxu0 %v618_v20 }
 0x527   :  { %v4270_v21 = vpop.eup %4269  ;;  %3814 = vmatprep.mubr.msk.bf16.mxu1 %vm4346_vm1, %v4345_v15  ;;  %3824 = vmatprep.subr.bf16.mxu1 %v4345_v15 }
 0x528   :  { %v461_v22 = vmul.f32 %v4270_v21, %v4262_v0  ;;  %3832 = vmatprep.subr.bf16.mxu0 %v4345_v15  ;;  %v3994_v21 = vld [vmem:[%s5054_s4 + $0x8] sm:$0xff]  }
 0x52a   :  { %v465_v27 = vpack.c.bf16 %v461_v22, %v461_v22 }
 0x52b   :  { %v4272_v28 = vpop.eup %4271 }
 0x52c   :  { %v462_v29 = vmul.f32 %v4272_v28, %v4264_v2  ;;  %v678_v2 = vrot.slane %v4478_v40, %v4595_v1 }
 0x52d   :  { %3815 = vmatmul.mubr.msk.bf16.vlgmr.msra.gmra.mrb[16].mxu1 %vm418_vm3, %v465_v27 }
 0x52e   :  { %v466_v31 = vpack.c.bf16 %v462_v29, %v462_v29  ;;  %3828 = vmatprep.mubr.msk.bf16.mxu1 %vm4346_vm1, %v4345_v15  ;;  %3825 = vmatpush3.bf16.msra.mxu1 %v3991_v32 }
 0x52f   :  { %3826 = vmatprep.subr.bf16.mxu1 %v4345_v15 }
 0x530   :  { %3821 = vmatmul.mubr.msk.bf16.vlgmr.msra.gmra.mrb[12].mxu0 %vm418_vm3, %v466_v31 }
 0x531   :  { %3836 = vmatprep.mubr.msk.bf16.mxu0 %vm4346_vm1, %v4345_v15 }
 0x532   :  { %3827 = vmatpush3.bf16.msra.mxu1 %v3992_v43 }
 0x533   :  { %3840 = vmatprep.subr.bf16.mxu1 %v4345_v15 }
 0x594   :  { %v558_v33 = vpop.f32.mrb[8].mxu0 }
 0x595   :  { %v3810_v34 = vpop.f32.mrb[9].mxu0 }
 0x596   :  { %v561_v35 = vpop.f32.mrb[10].mxu0 }
 0x597   :  { %v3811_v38 = vpop.f32.mrb[11].mxu0 }
 0x5f8   :  { %v510_v41 = vpop.f32.mrb[12].mxu1 }
 0x5f9   :  { %v3804_v42 = vpop.f32.mrb[13].mxu1 }
 0x5fa   :  { %v513_v44 = vpop.f32.mrb[14].mxu1 }
 0x5fb   :  { %v3805_v45 = vpop.f32.mrb[15].mxu1 }
 0x600   :  { %v606_v47 = vpop.f32.mrb[16].mxu1 }
 0x601   :  { %v3816_v48 = vpop.f32.mrb[17].mxu1 }
 0x602   :  { %v609_v50 = vpop.f32.mrb[18].mxu1 }
 0x603   :  { %v3817_v52 = vpop.f32.mrb[19].mxu1  ;;  %v654_v54 = vpop.f32.mrb[12].mxu0 }
 0x604   :  { %v3979_v55 = vpack.i.bf16 %v654_v54, %v606_v47  ;;  %v3822_v56 = vpop.f32.mrb[13].mxu0  ;;  %v3995_v54 = vld [vmem:[%s5055_s5] sm:$0xff]  }
 0x605   :  { %v657_v57 = vpop.f32.mrb[14].mxu0  ;;  %v3997_v56 = vld [vmem:[%s5055_s5 + $0x10] sm:$0xff]  }
 0x606   :  { %v3823_v58 = vpop.f32.mrb[15].mxu0  ;;  %3980 = vrot.lane.b32.xlu0 %v3979_v55, %s4344_s28  ;;  %v3996_v55 = vld [vmem:[%s5055_s5 + $0x8] sm:$0xff]   ;;  %v3998_v57 = vld [vmem:[%s5055_s5 + $0x18] sm:$0xff]  }
 0x607   :  { %v3999_v58 = vld [vmem:[%s5055_s5 + $0x20] sm:$0xff]  }
 0x678   :  { %v3981_v59 = vpop.permute.xlu0 %3980 }
 0x679   :  { %v3983_v60 = vunpack.i.h.bf16 %v3981_v59  ;;  %v3982_v61 = vunpack.i.l.bf16 %v3981_v59  ;;  %v4000_v59 = vld [vmem:[%s5055_s5 + $0x28] sm:$0xff]  }
 0x67b   :  { %v669_v62 = vsel %vm223_vm2, %v558_v33, %v3983_v60  ;;  %v668_v63 = vsel %vm223_vm2, %v510_v41, %v3982_v61  ;;  %v4614_v33 = vsub.s32 2, %v4450_v24  ;;  %v771_v41 = vsub.s32 3, %v4450_v24  ;;  %v4001_v60 = vld [vmem:[%s5055_s5 + $0x30] sm:$0xff]   ;;  %v4002_v61 = vld [vmem:[%s5055_s5 + $0x38] sm:$0xff]  }
 0x67c   :  { %v670_v0 = vpack.c.bf16 %v669_v62, %v668_v63  ;;  %v782_v62 = vsub.s32 4, %v4450_v24 }
 0x67d   :  { %v766_v35 = vrot.slane %v4478_v40, %v4614_v33  ;;  %v772_v45 = vrot.slane %v4478_v40, %v771_v41 }
 0x67e   :  { %3829 = vmatmul.mubr.msk.bf16.vlgmr.msra.gmra.mrb[20].mxu1 %vm59_vm0, %v670_v0  ;;  %v783_v63 = vrot.slane %v4478_v40, %v782_v62 }
 0x67f   :  { %3856 = vmatprep.mubr.msk.bf16.mxu1 %vm4346_vm1, %v4345_v15  ;;  %3841 = vmatpush3.bf16.msra.mxu1 %v3995_v54 }
 0x680   :  { %3842 = vmatprep.subr.bf16.mxu1 %v4345_v15 }
 0x683   :  { %3843 = vmatpush3.bf16.msra.mxu1 %v3996_v55 }
 0x684   :  { %3844 = vmatprep.subr.bf16.mxu1 %v4345_v15 }
 0x687   :  { %3845 = vmatpush3.bf16.msra.mxu1 %v3997_v56 }
 0x688   :  { %3846 = vmatprep.subr.bf16.mxu1 %v4345_v15 }
 0x68b   :  { %3847 = vmatpush3.bf16.msra.mxu1 %v3998_v57 }
 0x68c   :  { %3848 = vmatprep.subr.bf16.mxu1 %v4345_v15 }
 0x68f   :  { %3849 = vmatpush3.bf16.msra.mxu1 %v3999_v58 }
 0x690   :  { %3850 = vmatprep.subr.bf16.mxu1 %v4345_v15 }
 0x693   :  { %3851 = vmatpush3.bf16.msra.mxu1 %v4000_v59 }
 0x694   :  { %3852 = vmatprep.subr.bf16.mxu1 %v4345_v15 }
 0x697   :  { %3853 = vmatpush3.bf16.msra.mxu1 %v4001_v60  ;;  %v4004_v60 = vld [vmem:[%s5052_s2 + $0x18] sm:$0xff]  }
 0x698   :  { %3854 = vmatprep.subr.bf16.mxu1 %v4345_v15 }
 0x69b   :  { %3855 = vmatpush3.bf16.msra.mxu1 %v4002_v61 }
 0x69c   :  { %3886 = vmatprep.subr.bf16.mxu1 %v4345_v15 }
 0x751   :  { %v728_v3 = vpop.f32.mrb[20].mxu1 }
 0x752   :  { %v729_v49 = vadd.f32 %v728_v3, %v678_v2  ;;  %v3830_v51 = vpop.f32.mrb[21].mxu1 }
 0x753   :  { %v731_v4 = vpop.f32.mrb[22].mxu1 }
 0x754   :  { %v732_v6 = vadd.f32 %v731_v4, %v678_v2  ;;  %v3831_v7 = vpop.f32.mrb[23].mxu1  ;;  %v735_v8 = vadd.f32 %v729_v49, %v4463_v36 }
 0x756   :  { %v737_v53 = vsel %vm59_vm0, %v735_v8, 0.0  ;;  %v736_v46 = vadd.f32 %v732_v6, %v4465_v37  ;;  %v3993_v37 = vld [vmem:[%s5054_s4] sm:$0xff]  }
 0x757   :  { %738 = vadd.xlane.f32.xlu1 %v737_v53  ;;  %3833 = vmatpush3.bf16.msra.mxu0 %v3993_v37 }
 0x758   :  { %v740_v9 = vsel %vm59_vm0, %v736_v46, 0.0  ;;  %3834 = vmatprep.subr.bf16.mxu0 %v4345_v15 }
 0x759   :  { %741 = vadd.xlane.f32.xlu0 %v740_v9 }
 0x75b   :  { %3835 = vmatpush3.bf16.msra.mxu0 %v3994_v21 }
 0x75c   :  { %3860 = vmatprep.subr.bf16.mxu0 %v4345_v15 }
 0x7e4   :  { %v739_v11 = vpop.xlane.xlu1 %738 }
 0x7e5   :  { %v743_v12 = vmul.f32 0.03125, %v739_v11 }
 0x7e6   :  { %v742_v13 = vpop.xlane.xlu0 %741 }
 0x7e7   :  { %v745_v14 = vsub.f32 %v735_v8, %v743_v12  ;;  %v744_v16 = vmul.f32 0.03125, %v742_v13 }
 0x7e9   :  { %v746_v17 = vsub.f32 %v736_v46, %v744_v16  ;;  %v747_v18 = vmul.f32 %v745_v14, %v745_v14 }
 0x7eb   :  { %v749_v19 = vsel %vm59_vm0, %v747_v18, 0.0  ;;  %v748_v20 = vmul.f32 %v746_v17, %v746_v17 }
 0x7ec   :  { %750 = vadd.xlane.f32.xlu0 %v749_v19 }
 0x7ed   :  { %v752_v36 = vsel %vm59_vm0, %v748_v20, 0.0 }
 0x7f0   :  { %753 = vadd.xlane.f32.xlu0 %v752_v36 }
 0x879   :  { %v751_v22 = vpop.xlane.xlu0 %750 }
 0x87a   :  { %v755_v27 = vmul.f32 0.03125, %v751_v22 }
 0x87c   :  { %v757_v28 = vadd.f32 1e-12, %v755_v27  ;;  %v878_v27 = vrot.slane %v4478_v40, %v4453_v25 }
 0x87d   :  { %v754_v29 = vpop.xlane.xlu0 %753 }
 0x87e   :  { %4273 = vrsqrt.f32 %v757_v28  ;;  %v756_v31 = vmul.f32 0.03125, %v754_v29 }
 0x880   :  { %v758_v32 = vadd.f32 1e-12, %v756_v31 }
 0x882   :  { %4275 = vrsqrt.f32 %v758_v32 }
 0x888   :  { %v4274_v34 = vpop.eup %4273 }
 0x889   :  { %v761_v38 = vmul.f32 %v4274_v34, %v745_v14 }
 0x88b   :  { %v767_v43 = vmul.f32 %v766_v35, %v761_v38 }
 0x88c   :  { %v4276_v42 = vpop.eup %4275 }
 0x88d   :  { %v762_v44 = vmul.f32 %v4276_v42, %v746_v17  ;;  %v4622_v48 = vadd.f32 %v772_v45, %v767_v43 }
 0x88f   :  { %v768_v47 = vmul.f32 %v766_v35, %v762_v44 }
 0x891   :  { %v4624_v50 = vadd.f32 %v772_v45, %v768_v47 }
 0x893   :  { %v775_v52 = vpack.c.bf16 %v4624_v50, %v4622_v48 }
 0x895   :  { %3837 = vmatmul.mubr.msk.bf16.vlgmr.msra.gmra.mrb[16].mxu0 %vm59_vm0, %v775_v52 }
 0x896   :  { %3864 = vmatprep.mubr.msk.bf16.mxu0 %vm4346_vm1, %v4345_v15 }
 0x968   :  { %v833_v0 = vpop.f32.mrb[16].mxu0 }
 0x969   :  { %v834_v2 = vadd.f32 %v833_v0, %v783_v63  ;;  %v3838_v3 = vpop.f32.mrb[17].mxu0 }
 0x96a   :  { %v836_v49 = vpop.f32.mrb[18].mxu0 }
 0x96b   :  { %v840_v51 = vmul.f32 %v834_v2, %v834_v2  ;;  %v837_v4 = vadd.f32 %v836_v49, %v783_v63  ;;  %v3839_v6 = vpop.f32.mrb[19].mxu0 }
 0x96d   :  { %v842_v7 = vmul.f32 %v840_v51, %v834_v2  ;;  %v841_v8 = vmul.f32 %v837_v4, %v837_v4  ;;  %v999_v51 = vrot.slane %v4478_v40, %v4460_v30 }
 0x96f   :  { %v844_v53 = vmul.f32 0.044715, %v842_v7  ;;  %v843_v46 = vmul.f32 %v841_v8, %v837_v4 }
 0x971   :  { %v846_v9 = vadd.f32 %v844_v53, %v834_v2  ;;  %v845_v11 = vmul.f32 0.044715, %v843_v46 }
 0x973   :  { %v848_v12 = vmul.f32 0.7978846, %v846_v9  ;;  %v847_v13 = vadd.f32 %v845_v11, %v837_v4 }
 0x975   :  { %4277 = vtanh.f32 %v848_v12  ;;  %v849_v14 = vmul.f32 0.7978846, %v847_v13 }
 0x977   :  { %4279 = vtanh.f32 %v849_v14 }
 0x97f   :  { %v4278_v16 = vpop.eup %4277 }
 0x980   :  { %v852_v17 = vadd.f32 1.0, %v4278_v16  ;;  %v4703_v16 = vld [vmem:[%s5056_s6 + $0x8] sm:$0xff] }
 0x981   :  { %v4280_v18 = vpop.eup %4279 }
 0x982   :  { %v854_v19 = vmul.f32 0.5, %v852_v17  ;;  %v853_v20 = vadd.f32 1.0, %v4280_v18 }
 0x984   :  { %v855_v36 = vmul.f32 0.5, %v853_v20  ;;  %v856_v37 = vmul.f32 %v854_v19, %v834_v2 }
 0x986   :  { %v857_v21 = vmul.f32 %v855_v36, %v837_v4  ;;  %v1004_v4 = vsub.s32 7, %v4450_v24  ;;  %v4026_v24 = vld [vmem:[%s5057_s7 + $0x28] ss:$16 sps:$4 sm:$0xff]  }
 0x988   :  { %v858_v22 = vpack.c.bf16 %v857_v21, %v856_v37  ;;  %v1005_v9 = vrot.slane %v4478_v40, %v1004_v4  ;;  %v1019_v40 = vrot.slane %v4703_v16, %v4473_v39 }
 0x98a   :  { %3857 = vmatmul.mubr.bf16.vlgmr.msra.gmra.mrb[24].mxu1 %v858_v22 }
 0x98b   :  { %3888 = vmatprep.mubr.msk.bf16.mxu1 %vm4346_vm1, %v4345_v15 }
 0xa5d   :  { %v961_v28 = vpop.f32.mrb[24].mxu1 }
 0xa5e   :  { %v962_v29 = vadd.f32 %v961_v28, %v878_v27  ;;  %v3858_v31 = vpop.f32.mrb[25].mxu1 }
 0xa5f   :  { %v964_v32 = vpop.f32.mrb[26].mxu1 }
 0xa60   :  { %v965_v34 = vadd.f32 %v964_v32, %v878_v27  ;;  %v3859_v35 = vpop.f32.mrb[27].mxu1  ;;  %v968_v38 = vadd.f32 %v962_v29, %v4622_v48 }
 0xa62   :  { %v970_v42 = vsel %vm59_vm0, %v968_v38, 0.0  ;;  %v969_v43 = vadd.f32 %v965_v34, %v4624_v50  ;;  %v4003_v50 = vld [vmem:[%s5052_s2 + $0x10] sm:$0xff]  }
 0xa63   :  { %971 = vadd.xlane.f32.xlu1 %v970_v42  ;;  %3861 = vmatpush3.bf16.msra.mxu0 %v4003_v50 }
 0xa64   :  { %v973_v44 = vsel %vm59_vm0, %v969_v43, 0.0  ;;  %3862 = vmatprep.subr.bf16.mxu0 %v4345_v15 }
 0xa65   :  { %974 = vadd.xlane.f32.xlu0 %v973_v44 }
 0xa67   :  { %3863 = vmatpush3.bf16.msra.mxu0 %v4004_v60 }
 0xa68   :  { %3868 = vmatprep.subr.bf16.mxu0 %v4345_v15 }
 0xaf0   :  { %v972_v45 = vpop.xlane.xlu1 %971 }
 0xaf1   :  { %v976_v47 = vmul.f32 0.03125, %v972_v45 }
 0xaf2   :  { %v975_v52 = vpop.xlane.xlu0 %974 }
 0xaf3   :  { %v978_v54 = vsub.f32 %v968_v38, %v976_v47  ;;  %v977_v55 = vmul.f32 0.03125, %v975_v52 }
 0xaf5   :  { %v979_v56 = vsub.f32 %v969_v43, %v977_v55  ;;  %v980_v57 = vmul.f32 %v978_v54, %v978_v54 }
 0xaf7   :  { %v982_v58 = vsel %vm59_vm0, %v980_v57, 0.0  ;;  %v981_v59 = vmul.f32 %v979_v56, %v979_v56 }
 0xaf8   :  { %983 = vadd.xlane.f32.xlu1 %v982_v58 }
 0xaf9   :  { %v985_v48 = vsel %vm59_vm0, %v981_v59, 0.0 }
 0xafa   :  { %986 = vadd.xlane.f32.xlu0 %v985_v48 }
 0xb85   :  { %v984_v61 = vpop.xlane.xlu1 %983 }
 0xb86   :  { %v988_v63 = vmul.f32 0.03125, %v984_v61 }
 0xb87   :  { %v987_v0 = vpop.xlane.xlu0 %986 }
 0xb88   :  { %v990_v2 = vadd.f32 1e-12, %v988_v63  ;;  %v989_v3 = vmul.f32 0.03125, %v987_v0 }
 0xb8a   :  { %4281 = vrsqrt.f32 %v990_v2  ;;  %v991_v49 = vadd.f32 1e-12, %v989_v3 }
 0xb8c   :  { %4283 = vrsqrt.f32 %v991_v49 }
 0xb94   :  { %v4282_v6 = vpop.eup %4281 }
 0xb95   :  { %v994_v7 = vmul.f32 %v4282_v6, %v978_v54 }
 0xb96   :  { %v4284_v8 = vpop.eup %4283 }
 0xb97   :  { %v1000_v53 = vmul.f32 %v999_v51, %v994_v7  ;;  %v995_v46 = vmul.f32 %v4284_v8, %v979_v56 }
 0xb99   :  { %v1001_v11 = vmul.f32 %v999_v51, %v995_v46  ;;  %v4691_v12 = vadd.f32 %v1005_v9, %v1000_v53 }
 0xb9b   :  { %v4693_v13 = vadd.f32 %v1005_v9, %v1001_v11 }
 0xb9d   :  { %v1010_v14 = vpack.c.bf16 %v4693_v13, %v4691_v12 }
 0xb9f   :  { %3865 = vmatmul.mubr.msk.bf16.vlgmr.msra.gmra.mrb[20].mxu0 %vm59_vm0, %v1010_v14 }
 0xba0   :  { %3870 = vmatprep.mubr.msk.bf16.mxu0 %vm4346_vm1, %v4345_v15 }
 0xc72   :  { %v1069_v17 = vpop.f32.mrb[20].mxu0 }
 0xc73   :  { %v1070_v18 = vadd.f32 %v1069_v17, %v1019_v40  ;;  %v3866_v19 = vpop.f32.mrb[21].mxu0 }
 0xc74   :  { %v1072_v20 = vpop.f32.mrb[22].mxu0 }
 0xc75   :  { %v3654_v36 = vpack.c.bf16 %v1070_v18, %v1070_v18  ;;  %v1073_v37 = vadd.f32 %v1072_v20, %v1019_v40  ;;  %v3867_v21 = vpop.f32.mrb[23].mxu0 }
 0xc77   :  { %v4707_v22 = vpack.c.bf16 %v1073_v37, %v1073_v37  ;;  %1082 = vrot.lane.b32.xlu1 %v3654_v36, %s4347_s22 }
 0xc79   :  { %1084 = vrot.lane.b32.xlu0 %v4707_v22, %s4347_s22 }
 0xc7b   :  { %1086 = vrot.lane.b32.xlu1 %v3654_v36, %s4348_s23 }
 0xc7f   :  { %1134 = vrot.lane.b32.xlu1 %v4707_v22, %s4348_s23 }
 0xce9   :  { %v1083_v27 = vpop.permute.xlu1 %1082 }
 0xcea   :  { %v4715_v28 = vcombine.low %v1083_v27, %v1083_v27 }
 0xceb   :  { %v1085_v29 = vpop.permute.xlu0 %1084 }
 0xcec   :  { %v4717_v31 = vcombine.low %v1085_v29, %v1085_v29  ;;  %1184 = vrot.lane.b32.xlu1 %v4715_v28, %s4348_s23 }
 0xced   :  { %v1087_v32 = vpop.permute.xlu1 %1086 }
 0xcee   :  { %v1092_v34 = vsel %vm223_vm2, %v1087_v32, 0  ;;  %1234 = vrot.lane.b32.xlu0 %v4717_v31, %s4348_s23 }
 0xcef   :  { %3869 = vmatpush3.bf16.xpose.msra.mxu0 %v1092_v34 }
 0xcf0   :  { %3874 = vmatprep.subr.bf16.mxu0 %v4345_v15 }
 0xcf1   :  { %v1135_v35 = vpop.permute.xlu1 %1134 }
 0xcf2   :  { %v1140_v38 = vsel %vm223_vm2, %v1135_v35, 0 }
 0xcf6   :  { %3871 = vmatmul.mubr.msk.bf16.vlgmr.msra.gmra.mrb[24].mxu0 %vm223_vm2, %v3654_v36 }
 0xcf7   :  { %3875 = vmatpush3.bf16.xpose.msra.mxu0 %v1140_v38  ;;  %3876 = vmatprep.mubr.msk.bf16.mxu0 %vm4346_vm1, %v4345_v15 }
 0xcf8   :  { %3880 = vmatprep.subr.bf16.mxu0 %v4345_v15 }
 0xcfe   :  { %3877 = vmatmul.mubr.msk.bf16.vlgmr.msra.gmra.mrb[28].mxu0 %vm223_vm2, %v4707_v22 }
 0xcff   :  { %3882 = vmatprep.mubr.msk.bf16.mxu0 %vm4346_vm1, %v4345_v15 }
 0xd5e   :  { %v1185_v42 = vpop.permute.xlu1 %1184 }
 0xd5f   :  { %v1190_v43 = vsel %vm223_vm2, %v1185_v42, 0 }
 0xd60   :  { %3881 = vmatpush3.bf16.xpose.msra.mxu0 %v1190_v43  ;;  %v1235_v44 = vpop.permute.xlu0 %1234 }
 0xd61   :  { %v1240_v45 = vsel %vm223_vm2, %v1235_v44, 0  ;;  %3892 = vmatprep.subr.bf16.mxu0 %v4345_v15 }
 0xd62   :  { %3887 = vmatpush3.bf16.xpose.msra.mxu1 %v1240_v45 }
 0xd63   :  { %3898 = vmatprep.subr.bf16.mxu1 %v4345_v15 }
 0xd67   :  { %3883 = vmatmul.mubr.msk.bf16.vlgmr.msra.gmra.mrb[32].mxu0 %vm223_vm2, %v1083_v27 }
 0xd68   :  { %3894 = vmatprep.mubr.msk.bf16.mxu0 %vm4346_vm1, %v4345_v15 }
 0xd69   :  { %3889 = vmatmul.mubr.msk.bf16.vlgmr.msra.gmra.mrb[28].mxu1 %vm223_vm2, %v1085_v29 }
 0xd6a   :  { %3900 = vmatprep.mubr.msk.bf16.mxu1 %vm4346_vm1, %v4345_v15 }
 0xdc9   :  { %v1128_v47 = vpop.f32.mrb[24].mxu0 }
 0xdca   :  { %v1129_v52 = vadd.f32 %v1128_v47, %v4529_v5  ;;  %v3872_v54 = vpop.f32.mrb[25].mxu0 }
 0xdcb   :  { %v1131_v55 = vpop.f32.mrb[26].mxu0 }
 0xdcc   :  { %v3873_v56 = vpop.f32.mrb[27].mxu0  ;;  %v1282_v57 = vsel %vm418_vm3, %v1129_v52, -inf }
 0xdcd   :  { %1283 = vmax.xlane.f32.xlu1 %v1282_v57 }
 0xdd1   :  { %v1176_v58 = vpop.f32.mrb[28].mxu0 }
 0xdd2   :  { %v1177_v59 = vadd.f32 %v1176_v58, %v4533_v10  ;;  %v3878_v48 = vpop.f32.mrb[29].mxu0 }
 0xdd3   :  { %v1179_v50 = vpop.f32.mrb[30].mxu0 }
 0xdd4   :  { %v3879_v60 = vpop.f32.mrb[31].mxu0  ;;  %v1285_v61 = vsel %vm418_vm3, %v1177_v59, -inf }
 0xdd5   :  { %1286 = vmax.xlane.f32.xlu0 %v1285_v61 }
 0xdde   :  { %1330 = vrot.lane.b32.xlu1 %v3654_v36, %s4350_s1 }
 0xe3a   :  { %v1226_v63 = vpop.f32.mrb[32].mxu0 }
 0xe3b   :  { %v1227_v5 = vadd.f32 %v1226_v63, %v4539_v23  ;;  %v3884_v0 = vpop.f32.mrb[33].mxu0 }
 0xe3c   :  { %v1229_v2 = vpop.f32.mrb[34].mxu0  ;;  %v1276_v3 = vpop.f32.mrb[28].mxu1 }
 0xe3d   :  { %v1277_v49 = vadd.f32 %v1276_v3, %v4542_v26  ;;  %v3885_v51 = vpop.f32.mrb[35].mxu0  ;;  %v3890_v6 = vpop.f32.mrb[29].mxu1  ;;  %v1288_v10 = vsel %vm418_vm3, %v1227_v5, -inf }
 0xe3e   :  { %1289 = vmax.xlane.f32.xlu0 %v1288_v10  ;;  %v1279_v7 = vpop.f32.mrb[30].mxu1 }
 0xe3f   :  { %v3891_v8 = vpop.f32.mrb[31].mxu1  ;;  %v1291_v53 = vsel %vm418_vm3, %v1277_v49, -inf }
 0xe40   :  { %v4006_v8 = vld [vmem:[%s5053_s3 + $0x18] sm:$0xff]  }
 0xe42   :  { %1292 = vmax.xlane.f32.xlu0 %v1291_v53 }
 0xe5a   :  { %v1284_v46 = vpop.xlane.xlu1 %1283 }
 0xe5b   :  { %v1294_v9 = vsub.f32 %v1129_v52, %v1284_v46 }
 0xe5d   :  { %v1298_v11 = vmul.f32 1.442695, %v1294_v9 }
 0xe5e   :  { %v1331_v14 = vpop.permute.xlu1 %1330 }
 0xe5f   :  { %4285 = vpow2.f32 %v1298_v11  ;;  %v1336_v23 = vsel %vm472_vm4, %v1331_v14, 0 }
 0xe60   :  { %3893 = vmatpush3.bf16.msra.mxu0 %v1336_v23 }
 0xe61   :  { %3904 = vmatprep.subr.bf16.mxu0 %v4345_v15 }
 0xe62   :  { %v1287_v26 = vpop.xlane.xlu0 %1286 }
 0xe63   :  { %v1295_v40 = vsub.f32 %v1177_v59, %v1287_v26 }
 0xe65   :  { %v1300_v17 = vmul.f32 1.442695, %v1295_v40 }
 0xe67   :  { %4287 = vpow2.f32 %v1300_v17 }
 0xe69   :  { %v4286_v18 = vpop.eup %4285 }
 0xe6a   :  { %v1306_v19 = vsel %vm418_vm3, %v4286_v18, 0.0 }
 0xe6b   :  { %1307 = vadd.xlane.f32.xlu1 %v1306_v19 }
 0xe71   :  { %v4288_v20 = vpop.eup %4287 }
 0xe72   :  { %v1309_v36 = vsel %vm418_vm3, %v4288_v20, 0.0 }
 0xe73   :  { %1310 = vadd.xlane.f32.xlu0 %v1309_v36 }
 0xecb   :  { %v1290_v37 = vpop.xlane.xlu0 %1289 }
 0xecc   :  { %v1296_v21 = vsub.f32 %v1227_v5, %v1290_v37 }
 0xece   :  { %v1302_v27 = vmul.f32 1.442695, %v1296_v21 }
 0xecf   :  { %v1293_v29 = vpop.xlane.xlu0 %1292 }
 0xed0   :  { %4289 = vpow2.f32 %v1302_v27  ;;  %v1297_v32 = vsub.f32 %v1277_v49, %v1293_v29  ;;  %v4005_v49 = vld [vmem:[%s5053_s3 + $0x10] sm:$0xff]  }
 0xed2   :  { %v1304_v34 = vmul.f32 1.442695, %v1297_v32 }
 0xed4   :  { %4291 = vpow2.f32 %v1304_v34 }
 0xeda   :  { %v4290_v35 = vpop.eup %4289 }
 0xedb   :  { %v1312_v38 = vsel %vm418_vm3, %v4290_v35, 0.0 }
 0xedc   :  { %1313 = vadd.xlane.f32.xlu1 %v1312_v38 }
 0xede   :  { %v4292_v42 = vpop.eup %4291 }
 0xedf   :  { %v1315_v43 = vsel %vm418_vm3, %v4292_v42, 0.0 }
 0xee0   :  { %1316 = vadd.xlane.f32.xlu0 %v1315_v43 }
 0xeed   :  { %1426 = vrot.lane.b32.xlu1 %v4715_v28, %s4350_s1 }
 0xef1   :  { %1474 = vrot.lane.b32.xlu1 %v4717_v31, %s4350_s1 }
 0xef6   :  { %1378 = vrot.lane.b32.xlu0 %v4707_v22, %s4350_s1 }
 0xef8   :  { %v1308_v44 = vpop.xlane.xlu1 %1307 }
 0xef9   :  { %4293 = vrcp.f32 %v1308_v44 }
 0xf00   :  { %v1311_v54 = vpop.xlane.xlu0 %1310 }
 0xf01   :  { %4295 = vrcp.f32 %v1311_v54 }
 0xf03   :  { %v4294_v45 = vpop.eup %4293 }
 0xf04   :  { %v1322_v47 = vmul.f32 %v4294_v45, %v4286_v18 }
 0xf06   :  { %v1326_v52 = vpack.c.bf16 %v1322_v47, %v1322_v47 }
 0xf08   :  { %3895 = vmatmul.mubr.msk.bf16.vlgmr.msra.gmra.mrb[36].mxu0 %vm418_vm3, %v1326_v52 }
 0xf09   :  { %3906 = vmatprep.mubr.msk.bf16.mxu0 %vm4346_vm1, %v4345_v15 }
 0xf0b   :  { %v4296_v28 = vpop.eup %4295 }
 0xf0c   :  { %v1323_v22 = vmul.f32 %v4296_v28, %v4288_v20 }
 0xf0e   :  { %v1327_v60 = vpack.c.bf16 %v1323_v22, %v1323_v22 }
 0xf69   :  { %v1314_v55 = vpop.xlane.xlu1 %1313 }
 0xf6a   :  { %4297 = vrcp.f32 %v1314_v55 }
 0xf6d   :  { %v1427_v56 = vpop.permute.xlu1 %1426  ;;  %v1317_v31 = vpop.xlane.xlu0 %1316 }
 0xf6e   :  { %v1432_v57 = vsel %vm472_vm4, %v1427_v56, 0  ;;  %4299 = vrcp.f32 %v1317_v31 }
 0xf6f   :  { %3905 = vmatpush3.bf16.msra.mxu0 %v1432_v57 }
 0xf70   :  { %3916 = vmatprep.subr.bf16.mxu0 %v4345_v15 }
 0xf71   :  { %v1379_v58 = vpop.permute.xlu0 %1378  ;;  %v1475_v48 = vpop.permute.xlu1 %1474 }
 0xf72   :  { %v1384_v59 = vsel %vm472_vm4, %v1379_v58, 0  ;;  %v1480_v63 = vsel %vm472_vm4, %v1475_v48, 0 }
 0xf73   :  { %3899 = vmatpush3.bf16.msra.mxu1 %v1384_v59 }
 0xf74   :  { %v4298_v50 = vpop.eup %4297  ;;  %3910 = vmatprep.subr.bf16.mxu1 %v4345_v15 }
 0xf75   :  { %v1324_v61 = vmul.f32 %v4298_v50, %v4290_v35  ;;  %v1541_v35 = vrot.slane %v4703_v16, %v4595_v1 }
 0xf76   :  { %3901 = vmatmul.mubr.msk.bf16.vlgmr.msra.gmra.mrb[32].mxu1 %vm418_vm3, %v1327_v60 }
 0xf77   :  { %3911 = vmatpush3.bf16.msra.mxu1 %v1480_v63  ;;  %v1328_v5 = vpack.c.bf16 %v1324_v61, %v1324_v61  ;;  %3912 = vmatprep.mubr.msk.bf16.mxu1 %vm4346_vm1, %v4345_v15  ;;  %v4008_v61 = vld [vmem:[%s5054_s4 + $0x18] sm:$0xff]  }
 0xf78   :  { %v4300_v0 = vpop.eup %4299  ;;  %3924 = vmatprep.subr.bf16.mxu1 %v4345_v15 }
 0xf79   :  { %v1325_v2 = vmul.f32 %v4300_v0, %v4292_v42  ;;  %3907 = vmatmul.mubr.msk.bf16.vlgmr.msra.gmra.mrb[40].mxu0 %vm418_vm3, %v1328_v5 }
 0xf7a   :  { %3920 = vmatprep.mubr.msk.bf16.mxu0 %vm4346_vm1, %v4345_v15  ;;  %3917 = vmatpush3.bf16.msra.mxu0 %v4005_v49 }
 0xf7b   :  { %v1329_v3 = vpack.c.bf16 %v1325_v2, %v1325_v2  ;;  %3918 = vmatprep.subr.bf16.mxu0 %v4345_v15 }
 0xf7e   :  { %3913 = vmatmul.mubr.msk.bf16.vlgmr.msra.gmra.mrb[36].mxu1 %vm418_vm3, %v1329_v3  ;;  %3919 = vmatpush3.bf16.msra.mxu0 %v4006_v8 }
 0xf7f   :  { %3928 = vmatprep.mubr.msk.bf16.mxu1 %vm4346_vm1, %v4345_v15  ;;  %3932 = vmatprep.subr.bf16.mxu0 %v4345_v15 }
 0xfdb   :  { %v1372_v51 = vpop.f32.mrb[36].mxu0 }
 0xfdc   :  { %v3896_v6 = vpop.f32.mrb[37].mxu0 }
 0xfdd   :  { %v1375_v10 = vpop.f32.mrb[38].mxu0  ;;  %v1629_v6 = vrot.slane %v4703_v16, %v4614_v33 }
 0xfde   :  { %v3897_v7 = vpop.f32.mrb[39].mxu0 }
0x1049   :  { %v1420_v53 = vpop.f32.mrb[32].mxu1 }
0x104a   :  { %v3902_v46 = vpop.f32.mrb[33].mxu1 }
0x104b   :  { %v1423_v9 = vpop.f32.mrb[34].mxu1  ;;  %v1635_v46 = vrot.slane %v4703_v16, %v771_v41  ;;  %v4010_v41 = vld [vmem:[%s5055_s5 + $0x48] sm:$0xff]  }
0x104c   :  { %v3903_v11 = vpop.f32.mrb[35].mxu1  ;;  %v1468_v14 = vpop.f32.mrb[40].mxu0 }
0x104d   :  { %v3908_v23 = vpop.f32.mrb[41].mxu0 }
0x104e   :  { %v1471_v26 = vpop.f32.mrb[42].mxu0 }
0x104f   :  { %v3909_v40 = vpop.f32.mrb[43].mxu0  ;;  %v4009_v26 = vld [vmem:[%s5055_s5 + $0x40] sm:$0xff]  }
0x1050   :  { %v4011_v40 = vld [vmem:[%s5055_s5 + $0x50] sm:$0xff]  }
0x1051   :  { %v1516_v17 = vpop.f32.mrb[36].mxu1 }
0x1052   :  { %v3984_v18 = vpack.i.bf16 %v1516_v17, %v1468_v14  ;;  %v3914_v19 = vpop.f32.mrb[37].mxu1  ;;  %v4012_v17 = vld [vmem:[%s5055_s5 + $0x58] sm:$0xff]  }
0x1053   :  { %v1519_v20 = vpop.f32.mrb[38].mxu1  ;;  %v4014_v19 = vld [vmem:[%s5055_s5 + $0x68] sm:$0xff]  }
0x1054   :  { %3985 = vrot.lane.b32.xlu1 %v3984_v18, %s4344_s28  ;;  %v3915_v36 = vpop.f32.mrb[39].mxu1  ;;  %v4013_v18 = vld [vmem:[%s5055_s5 + $0x60] sm:$0xff]   ;;  %v4015_v20 = vld [vmem:[%s5055_s5 + $0x70] sm:$0xff]  }
0x1055   :  { %v4016_v36 = vld [vmem:[%s5055_s5 + $0x78] sm:$0xff]  }
0x10c6   :  { %v3986_v37 = vpop.permute.xlu1 %3985 }
0x10c7   :  { %v3988_v21 = vunpack.i.h.bf16 %v3986_v37  ;;  %v3987_v27 = vunpack.i.l.bf16 %v3986_v37  ;;  %v1647_v37 = vrot.slane %v4703_v16, %v782_v62 }
0x10c9   :  { %v1531_v29 = vsel %vm223_vm2, %v1420_v53, %v3988_v21  ;;  %v1530_v32 = vsel %vm223_vm2, %v1372_v51, %v3987_v27 }
0x10ca   :  { %v1532_v34 = vpack.c.bf16 %v1531_v29, %v1530_v32 }
0x10cc   :  { %3921 = vmatmul.mubr.msk.bf16.vlgmr.msra.gmra.mrb[44].mxu0 %vm59_vm0, %v1532_v34 }
0x10cd   :  { %3948 = vmatprep.mubr.msk.bf16.mxu0 %vm4346_vm1, %v4345_v15  ;;  %3933 = vmatpush3.bf16.msra.mxu0 %v4009_v26  ;;  %v4020_v26 = vld [vmem:[%s5057_s7 + $0x20] ss:$16 sps:$4 sm:$0xff]  }
0x10ce   :  { %3934 = vmatprep.subr.bf16.mxu0 %v4345_v15 }
0x10d1   :  { %3935 = vmatpush3.bf16.msra.mxu0 %v4010_v41  ;;  %v4022_v41 = vld [vmem:[%s5057_s7 + $0x24] ss:$16 sps:$4 sm:$0xff]  }
0x10d2   :  { %3936 = vmatprep.subr.bf16.mxu0 %v4345_v15 }
0x10d5   :  { %3937 = vmatpush3.bf16.msra.mxu0 %v4011_v40  ;;  %v4351_v40 = vmov 0  }
0x10d6   :  { %3938 = vmatprep.subr.bf16.mxu0 %v4345_v15 }
0x10d9   :  { %3939 = vmatpush3.bf16.msra.mxu0 %v4012_v17  ;;  %v4025_v17 = vld [vmem:[%s5057_s7 + $0xc] ss:$16 sps:$4 sm:$0xff]  }
0x10da   :  { %3940 = vmatprep.subr.bf16.mxu0 %v4345_v15 }
0x10dd   :  { %3941 = vmatpush3.bf16.msra.mxu0 %v4013_v18  ;;  %v4032_v18 = vld [vmem:[#allocation2 + $0x8] ss:$16 sps:$4 sm:$0xff]  }
0x10de   :  { %3942 = vmatprep.subr.bf16.mxu0 %v4345_v15 }
0x10e1   :  { %3943 = vmatpush3.bf16.msra.mxu0 %v4014_v19  ;;  %v4034_v19 = vld [vmem:[#allocation2 + $0xc] ss:$16 sps:$4 sm:$0xff]  }
0x10e2   :  { %3944 = vmatprep.subr.bf16.mxu0 %v4345_v15 }
0x10e5   :  { %3945 = vmatpush3.bf16.msra.mxu0 %v4015_v20  ;;  %v4040_v20 = vld [vmem:[#allocation2 + $0x2c] ss:$16 sps:$4 sm:$0xff]  }
0x10e6   :  { %3946 = vmatprep.subr.bf16.mxu0 %v4345_v15 }
0x10e9   :  { %3947 = vmatpush3.bf16.msra.mxu0 %v4016_v36  ;;  %v4038_v36 = vld [vmem:[#allocation2 + $0x28] ss:$16 sps:$4 sm:$0xff]  }
0x10ea   :  { %2902 = vmatprep.subr.bf16.mxu0 %v4034_v19  ;;  %v4067_v19 = vld [vmem:[#allocation2 + $0xc4] ss:$16 sps:$4 sm:$0xff]  }
0x119f   :  { %v1591_v38 = vpop.f32.mrb[44].mxu0 }
0x11a0   :  { %v1592_v42 = vadd.f32 %v1591_v38, %v1541_v35  ;;  %v3922_v43 = vpop.f32.mrb[45].mxu0 }
0x11a1   :  { %v1594_v44 = vpop.f32.mrb[46].mxu0 }
0x11a2   :  { %v1595_v45 = vadd.f32 %v1594_v44, %v1541_v35  ;;  %v3923_v47 = vpop.f32.mrb[47].mxu0  ;;  %v1598_v52 = vadd.f32 %v1592_v42, %v4691_v12 }
0x11a4   :  { %v1600_v54 = vsel %vm59_vm0, %v1598_v52, 0.0  ;;  %v1599_v55 = vadd.f32 %v1595_v45, %v4693_v13  ;;  %v4007_v13 = vld [vmem:[%s5054_s4 + $0x10] sm:$0xff]  }
0x11a5   :  { %1601 = vadd.xlane.f32.xlu0 %v1600_v54  ;;  %3925 = vmatpush3.bf16.msra.mxu1 %v4007_v13 }
0x11a6   :  { %v1603_v28 = vsel %vm59_vm0, %v1599_v55, 0.0  ;;  %3926 = vmatprep.subr.bf16.mxu1 %v4345_v15 }
0x11a7   :  { %1604 = vadd.xlane.f32.xlu1 %v1603_v28 }
0x11a9   :  { %3927 = vmatpush3.bf16.msra.mxu1 %v4008_v61 }
0x1232   :  { %v1602_v56 = vpop.xlane.xlu0 %1601 }
0x1233   :  { %v1606_v31 = vmul.f32 0.03125, %v1602_v56 }
0x1234   :  { %v1605_v57 = vpop.xlane.xlu1 %1604 }
0x1235   :  { %v1608_v22 = vsub.f32 %v1598_v52, %v1606_v31  ;;  %v1607_v58 = vmul.f32 0.03125, %v1605_v57 }
0x1237   :  { %v1609_v59 = vsub.f32 %v1599_v55, %v1607_v58  ;;  %v1610_v48 = vmul.f32 %v1608_v22, %v1608_v22 }
0x1239   :  { %v1612_v50 = vsel %vm59_vm0, %v1610_v48, 0.0  ;;  %v1611_v60 = vmul.f32 %v1609_v59, %v1609_v59 }
0x123a   :  { %1613 = vadd.xlane.f32.xlu0 %v1612_v50  ;;  %v1743_v50 = vrot.slane %v4703_v16, %v4453_v25 }
0x123b   :  { %v1615_v12 = vsel %vm59_vm0, %v1611_v60, 0.0 }
0x123e   :  { %1616 = vadd.xlane.f32.xlu0 %v1615_v12 }
0x12c7   :  { %v1614_v63 = vpop.xlane.xlu0 %1613 }
0x12c8   :  { %v1618_v5 = vmul.f32 0.03125, %v1614_v63 }
0x12ca   :  { %v1620_v0 = vadd.f32 1e-12, %v1618_v5 }
0x12cb   :  { %v1617_v2 = vpop.xlane.xlu0 %1616 }
0x12cc   :  { %4301 = vrsqrt.f32 %v1620_v0  ;;  %v1619_v3 = vmul.f32 0.03125, %v1617_v2 }
0x12ce   :  { %v1621_v49 = vadd.f32 1e-12, %v1619_v3 }
0x12d0   :  { %4303 = vrsqrt.f32 %v1621_v49 }
0x12d6   :  { %v4302_v51 = vpop.eup %4301 }
0x12d7   :  { %v1624_v10 = vmul.f32 %v4302_v51, %v1608_v22 }
0x12d9   :  { %v1630_v8 = vmul.f32 %v1629_v6, %v1624_v10 }
0x12da   :  { %v4304_v7 = vpop.eup %4303 }
0x12db   :  { %v1625_v53 = vmul.f32 %v4304_v7, %v1609_v59  ;;  %v4817_v11 = vadd.f32 %v1635_v46, %v1630_v8 }
0x12dd   :  { %v1631_v9 = vmul.f32 %v1629_v6, %v1625_v53 }
0x12df   :  { %v4819_v14 = vadd.f32 %v1635_v46, %v1631_v9 }
0x12e1   :  { %v1638_v23 = vpack.c.bf16 %v4819_v14, %v4817_v11 }
0x12e3   :  { %3929 = vmatmul.mubr.msk.bf16.vlgmr.msra.gmra.mrb[40].mxu1 %vm59_vm0, %v1638_v23  ;;  %v4017_v23 = vld [vmem:[%s5057_s7] ss:$16 sps:$4 sm:$0xff]  }
0x12e4   :  { %1978 = vmatprep.mubr.bf16.mxu1 %v4351_v40 }
0x13b6   :  { %v1697_v21 = vpop.f32.mrb[40].mxu1 }
0x13b7   :  { %v1698_v27 = vadd.f32 %v1697_v21, %v1647_v37  ;;  %v3930_v29 = vpop.f32.mrb[41].mxu1  ;;  %v4044_v21 = vld [vmem:[#allocation2 + $0x48] ss:$16 sps:$4 sm:$0xff]  }
0x13b8   :  { %v1700_v32 = vpop.f32.mrb[42].mxu1  ;;  %v4050_v29 = vld [vmem:[#allocation2 + $0x68] ss:$16 sps:$4 sm:$0xff]  }
0x13b9   :  { %v1704_v34 = vmul.f32 %v1698_v27, %v1698_v27  ;;  %v1701_v35 = vadd.f32 %v1700_v32, %v1647_v37  ;;  %v3931_v38 = vpop.f32.mrb[43].mxu1  ;;  %v4046_v37 = vld [vmem:[#allocation2 + $0x4c] ss:$16 sps:$4 sm:$0xff]  }
0x13ba   :  { %v4058_v32 = vld [vmem:[#allocation2 + $0x8c] ss:$16 sps:$4 sm:$0xff]   ;;  %v4062_v38 = vld [vmem:[#allocation2 + $0xa8] ss:$16 sps:$4 sm:$0xff]  }
0x13bb   :  { %v1706_v42 = vmul.f32 %v1704_v34, %v1698_v27  ;;  %v1705_v43 = vmul.f32 %v1701_v35, %v1701_v35  ;;  %v4056_v34 = vld [vmem:[#allocation2 + $0x88] ss:$16 sps:$4 sm:$0xff]  }
0x13bd   :  { %v1708_v44 = vmul.f32 0.044715, %v1706_v42  ;;  %v1707_v15 = vmul.f32 %v1705_v43, %v1701_v35  ;;  %v4070_v42 = vld [vmem:[#allocation2 + $0xcc] ss:$16 sps:$4 sm:$0xff]   ;;  %v4068_v43 = vld [vmem:[#allocation2 + $0xc8] ss:$16 sps:$4 sm:$0xff]  }
0x13bf   :  { %v1710_v45 = vadd.f32 %v1708_v44, %v1698_v27  ;;  %v1709_v47 = vmul.f32 0.044715, %v1707_v15  ;;  %v4076_v44 = vld [vmem:[#allocation2 + $0xec] ss:$16 sps:$4 sm:$0xff]   ;;  %v4074_v15 = vld [vmem:[#allocation2 + $0xe8] ss:$16 sps:$4 sm:$0xff]  }
0x13c1   :  { %v1712_v52 = vmul.f32 0.7978846, %v1710_v45  ;;  %v1711_v54 = vadd.f32 %v1709_v47, %v1701_v35  ;;  %v4082_v45 = vld [vmem:[#allocation2 + $0x10c] ss:$16 sps:$4 sm:$0xff]   ;;  %v4080_v47 = vld [vmem:[#allocation2 + $0x108] ss:$16 sps:$4 sm:$0xff]  }
0x13c3   :  { %4305 = vtanh.f32 %v1712_v52  ;;  %v1713_v55 = vmul.f32 0.7978846, %v1711_v54  ;;  %v4088_v52 = vld [vmem:[#allocation2 + $0x12c] ss:$16 sps:$4 sm:$0xff]   ;;  %v4086_v54 = vld [vmem:[#allocation2 + $0x128] ss:$16 sps:$4 sm:$0xff]  }
0x13c5   :  { %4307 = vtanh.f32 %v1713_v55  ;;  %v4094_v55 = vld [vmem:[#allocation2 + $0x14c] ss:$16 sps:$4 sm:$0xff]  }
0x13cd   :  { %v4306_v28 = vpop.eup %4305 }
0x13ce   :  { %v1716_v62 = vadd.f32 1.0, %v4306_v28  ;;  %v4092_v28 = vld [vmem:[#allocation2 + $0x148] ss:$16 sps:$4 sm:$0xff]  }
0x13cf   :  { %v4308_v56 = vpop.eup %4307 }
0x13d0   :  { %v1718_v31 = vmul.f32 0.5, %v1716_v62  ;;  %v1717_v57 = vadd.f32 1.0, %v4308_v56  ;;  %v4100_v62 = vld [vmem:[#allocation2 + $0x16c] ss:$16 sps:$4 sm:$0xff]   ;;  %v4098_v56 = vld [vmem:[#allocation2 + $0x168] ss:$16 sps:$4 sm:$0xff]  }
0x13d2   :  { %v1719_v22 = vmul.f32 0.5, %v1717_v57  ;;  %v1720_v58 = vmul.f32 %v1718_v31, %v1698_v27  ;;  %v4052_v27 = vld [vmem:[#allocation2 + $0x6c] ss:$16 sps:$4 sm:$0xff]   ;;  %v4104_v57 = vld [vmem:[#allocation2 + $0x188] ss:$16 sps:$4 sm:$0xff]  }
0x13d3   :  { %v4106_v31 = vld [vmem:[#allocation2 + $0x18c] ss:$16 sps:$4 sm:$0xff]  }
0x13d4   :  { %v1721_v59 = vmul.f32 %v1719_v22, %v1701_v35  ;;  %v4064_v35 = vld [vmem:[#allocation2 + $0xac] ss:$16 sps:$4 sm:$0xff]  }
0x13d5   :  { %v4112_v22 = vld [vmem:[#allocation2 + $0x1ac] ss:$16 sps:$4 sm:$0xff]  }
0x13d6   :  { %v1722_v48 = vpack.c.bf16 %v1721_v59, %v1720_v58  ;;  %v4110_v58 = vld [vmem:[#allocation2 + $0x1a8] ss:$16 sps:$4 sm:$0xff]  }
0x13d8   :  { %3949 = vmatmul.mubr.bf16.vlgmr.msra.gmra.mrb[48].mxu0 %v1722_v48 }
0x13d9   :  { %2903 = vmatpush1.bf16.msra.mxu0 %v4032_v18  ;;  %v4059_v18 = vld [vmem:[#allocation2 + $0xa0] ss:$16 sps:$4 sm:$0xff]  }
0x13da   :  { %2904 = vmatprep.subr.bf16.mxu0 %v4040_v20  ;;  %v4065_v20 = vld [vmem:[#allocation2 + $0xc0] ss:$16 sps:$4 sm:$0xff]  }
0x13dd   :  { %2905 = vmatpush1.bf16.msra.mxu0 %v4038_v36  ;;  %v4073_v36 = vld [vmem:[#allocation2 + $0xe4] ss:$16 sps:$4 sm:$0xff]  }
0x13de   :  { %2906 = vmatprep.subr.bf16.mxu0 %v4046_v37  ;;  %v4071_v37 = vld [vmem:[#allocation2 + $0xe0] ss:$16 sps:$4 sm:$0xff]  }
0x13e1   :  { %2907 = vmatpush1.bf16.msra.mxu0 %v4044_v21  ;;  %v4079_v21 = vld [vmem:[#allocation2 + $0x104] ss:$16 sps:$4 sm:$0xff]  }
0x13e2   :  { %2908 = vmatprep.subr.bf16.mxu0 %v4052_v27  ;;  %v4077_v27 = vld [vmem:[#allocation2 + $0x100] ss:$16 sps:$4 sm:$0xff]  }
0x13e5   :  { %2909 = vmatpush1.bf16.msra.mxu0 %v4050_v29  ;;  %v4085_v29 = vld [vmem:[#allocation2 + $0x124] ss:$16 sps:$4 sm:$0xff]  }
0x13e6   :  { %2910 = vmatprep.subr.bf16.mxu0 %v4058_v32  ;;  %v4083_v32 = vld [vmem:[#allocation2 + $0x120] ss:$16 sps:$4 sm:$0xff]  }
0x13e9   :  { %2911 = vmatpush1.bf16.msra.mxu0 %v4056_v34  ;;  %v4091_v34 = vld [vmem:[#allocation2 + $0x144] ss:$16 sps:$4 sm:$0xff]  }
0x13ea   :  { %2912 = vmatprep.subr.bf16.mxu0 %v4064_v35  ;;  %v4089_v35 = vld [vmem:[#allocation2 + $0x140] ss:$16 sps:$4 sm:$0xff]  }
0x13ed   :  { %2913 = vmatpush1.bf16.msra.mxu0 %v4062_v38  ;;  %v4097_v38 = vld [vmem:[#allocation2 + $0x164] ss:$16 sps:$4 sm:$0xff]  }
0x13ee   :  { %2914 = vmatprep.subr.bf16.mxu0 %v4070_v42  ;;  %v4095_v42 = vld [vmem:[#allocation2 + $0x160] ss:$16 sps:$4 sm:$0xff]  }
0x13f1   :  { %2915 = vmatpush1.bf16.msra.mxu0 %v4068_v43  ;;  %v4103_v43 = vld [vmem:[#allocation2 + $0x184] ss:$16 sps:$4 sm:$0xff]  }
0x13f2   :  { %2916 = vmatprep.subr.bf16.mxu0 %v4076_v44  ;;  %v4101_v44 = vld [vmem:[#allocation2 + $0x180] ss:$16 sps:$4 sm:$0xff]  }
0x13f5   :  { %2917 = vmatpush1.bf16.msra.mxu0 %v4074_v15  ;;  %v4109_v15 = vld [vmem:[#allocation2 + $0x1a4] ss:$16 sps:$4 sm:$0xff]  }
0x13f6   :  { %2918 = vmatprep.subr.bf16.mxu0 %v4082_v45  ;;  %v4107_v45 = vld [vmem:[#allocation2 + $0x1a0] ss:$16 sps:$4 sm:$0xff]  }
0x13f9   :  { %2919 = vmatpush1.bf16.msra.mxu0 %v4080_v47  ;;  %v4115_v47 = vld [vmem:[#allocation2 + $0x1c4] ss:$16 sps:$4 sm:$0xff]  }
0x13fa   :  { %2920 = vmatprep.subr.bf16.mxu0 %v4088_v52  ;;  %v4118_v52 = vld [vmem:[#allocation2 + $0x1cc] ss:$16 sps:$4 sm:$0xff]  }
0x13fd   :  { %2921 = vmatpush1.bf16.msra.mxu0 %v4086_v54  ;;  %v4113_v54 = vld [vmem:[#allocation2 + $0x1c0] ss:$16 sps:$4 sm:$0xff]  }
0x13fe   :  { %2922 = vmatprep.subr.bf16.mxu0 %v4094_v55  ;;  %v4116_v55 = vld [vmem:[#allocation2 + $0x1c8] ss:$16 sps:$4 sm:$0xff]  }
0x1401   :  { %2923 = vmatpush1.bf16.msra.mxu0 %v4092_v28  ;;  %v4121_v28 = vld [vmem:[#allocation2 + $0x1e4] ss:$16 sps:$4 sm:$0xff]  }
0x1402   :  { %2924 = vmatprep.subr.bf16.mxu0 %v4100_v62  ;;  %v4124_v62 = vld [vmem:[#allocation2 + $0x1ec] ss:$16 sps:$4 sm:$0xff]  }
0x1405   :  { %2925 = vmatpush1.bf16.msra.mxu0 %v4098_v56  ;;  %v4119_v56 = vld [vmem:[#allocation2 + $0x1e0] ss:$16 sps:$4 sm:$0xff]  }
0x1406   :  { %2926 = vmatprep.subr.bf16.mxu0 %v4106_v31  ;;  %v4122_v31 = vld [vmem:[#allocation2 + $0x1e8] ss:$16 sps:$4 sm:$0xff]  }
0x1409   :  { %2927 = vmatpush1.bf16.msra.mxu0 %v4104_v57  ;;  %v4127_v57 = vld [vmem:[#allocation2 + $0x204] ss:$16 sps:$4 sm:$0xff]  }
0x140a   :  { %2928 = vmatprep.subr.bf16.mxu0 %v4112_v22  ;;  %v4130_v22 = vld [vmem:[#allocation2 + $0x20c] ss:$16 sps:$4 sm:$0xff]  }
0x140d   :  { %2929 = vmatpush1.bf16.msra.mxu0 %v4110_v58  ;;  %v4912_v58 = vld [vmem:[%s5060_s10 + $0x8] sm:$0xff] }
0x140e   :  { %2930 = vmatprep.subr.bf16.mxu0 %v4118_v52  ;;  %v4170_v52 = vld [vmem:[#allocation2 + $0x2e8] ss:$16 sps:$4 sm:$0xff]  }
0x1411   :  { %2931 = vmatpush1.bf16.msra.mxu0 %v4116_v55  ;;  %v4178_v55 = vld [vmem:[#allocation2 + $0x30c] ss:$16 sps:$4 sm:$0xff]  }
0x1412   :  { %2932 = vmatprep.subr.bf16.mxu0 %v4124_v62  ;;  %v4176_v62 = vld [vmem:[#allocation2 + $0x308] ss:$16 sps:$4 sm:$0xff]  }
0x1415   :  { %2933 = vmatpush1.bf16.msra.mxu0 %v4122_v31  ;;  %v4184_v31 = vld [vmem:[#allocation2 + $0x32c] ss:$16 sps:$4 sm:$0xff]  }
0x1416   :  { %2943 = vmatprep.subr.bf16.mxu0 %v4130_v22  ;;  %v4182_v22 = vld [vmem:[#allocation2 + $0x328] ss:$16 sps:$4 sm:$0xff]  }
0x14ab   :  { %v1826_v60 = vpop.f32.mrb[48].mxu0 }
0x14ac   :  { %v1827_v12 = vadd.f32 %v1826_v60, %v1743_v50  ;;  %v3950_v13 = vpop.f32.mrb[49].mxu0 }
0x14ad   :  { %v1829_v61 = vpop.f32.mrb[50].mxu0 }
0x14ae   :  { %v1830_v63 = vadd.f32 %v1829_v61, %v1743_v50  ;;  %v3951_v5 = vpop.f32.mrb[51].mxu0  ;;  %v1833_v0 = vadd.f32 %v1827_v12, %v4817_v11 }
0x14b0   :  { %v1835_v2 = vsel %vm59_vm0, %v1833_v0, 0.0  ;;  %v1834_v3 = vadd.f32 %v1830_v63, %v4819_v14  ;;  %v4019_v14 = vld [vmem:[%s5057_s7 + $0x4] ss:$16 sps:$4 sm:$0xff]   ;;  %v1864_v63 = vrot.slane %v4703_v16, %v4460_v30  ;;  %v4023_v30 = vld [vmem:[%s5057_s7 + $0x8] ss:$16 sps:$4 sm:$0xff]  }
0x14b1   :  { %1836 = vadd.xlane.f32.xlu1 %v1835_v2  ;;  %1946 = vmatprep.subr.bf16.mxu1 %v4019_v14  ;;  %v4041_v14 = vld [vmem:[#allocation2 + $0x40] ss:$16 sps:$4 sm:$0xff]  }
0x14b2   :  { %v1838_v49 = vsel %vm59_vm0, %v1834_v3, 0.0  ;;  %1947 = vmatpush1.bf16.msra.mxu1 %v4017_v23  ;;  %v4049_v23 = vld [vmem:[#allocation2 + $0x64] ss:$16 sps:$4 sm:$0xff]  }
0x14b3   :  { %1839 = vadd.xlane.f32.xlu0 %v1838_v49  ;;  %1948 = vmatprep.subr.bf16.mxu1 %v4022_v41  ;;  %v4055_v41 = vld [vmem:[#allocation2 + $0x84] ss:$16 sps:$4 sm:$0xff]  }
0x14b6   :  { %1949 = vmatpush1.bf16.msra.mxu1 %v4020_v26  ;;  %v4047_v26 = vld [vmem:[#allocation2 + $0x60] ss:$16 sps:$4 sm:$0xff]  }
0x14b7   :  { %1987 = vmatprep.subr.bf16.mxu1 %v4025_v17  ;;  %v4061_v17 = vld [vmem:[#allocation2 + $0xa4] ss:$16 sps:$4 sm:$0xff]  }
0x153e   :  { %v1837_v51 = vpop.xlane.xlu1 %1836 }
0x153f   :  { %v1841_v6 = vmul.f32 0.03125, %v1837_v51 }
0x1540   :  { %v1840_v10 = vpop.xlane.xlu0 %1839 }
0x1541   :  { %v4864_v25 = vsub.f32 %v1833_v0, %v1841_v6  ;;  %v1842_v7 = vmul.f32 0.03125, %v1840_v10 }
0x1543   :  { %v4866_v8 = vsub.f32 %v1834_v3, %v1842_v7  ;;  %v1845_v53 = vmul.f32 %v4864_v25, %v4864_v25  ;;  %v1870_v3 = vrot.slane %v4703_v16, %v1004_v4  ;;  %v4031_v4 = vld [vmem:[#allocation2 + $0x4] ss:$16 sps:$4 sm:$0xff]   ;;  %v4029_v16 = vld [vmem:[#allocation2] ss:$16 sps:$4 sm:$0xff]  }
0x1545   :  { %v1847_v46 = vsel %vm59_vm0, %v1845_v53, 0.0  ;;  %v1846_v9 = vmul.f32 %v4866_v8, %v4866_v8 }
0x1546   :  { %1848 = vadd.xlane.f32.xlu1 %v1847_v46 }
0x1547   :  { %v1850_v11 = vsel %vm59_vm0, %v1846_v9, 0.0  ;;  %v4035_v9 = vld [vmem:[#allocation2 + $0x20] ss:$16 sps:$4 sm:$0xff]  }
0x1548   :  { %1851 = vadd.xlane.f32.xlu0 %v1850_v11  ;;  %v4043_v11 = vld [vmem:[#allocation2 + $0x44] ss:$16 sps:$4 sm:$0xff]  }
0x15d3   :  { %v1849_v59 = vpop.xlane.xlu1 %1848 }
0x15d4   :  { %v1853_v48 = vmul.f32 0.03125, %v1849_v59  ;;  %v4917_v59 = vld [vmem:[%s5060_s10] sm:$0xff] }
0x15d5   :  { %v1852_v50 = vpop.xlane.xlu0 %1851 }
0x15d6   :  { %v1855_v60 = vadd.f32 1e-12, %v1853_v48  ;;  %v1854_v12 = vmul.f32 0.03125, %v1852_v50  ;;  %v1890_v48 = vrot.slane %v4917_v59, %v4473_v39  ;;  %v1894_v50 = vrot.slane %v4912_v58, %v4473_v39 }
0x15d8   :  { %4309 = vrsqrt.f32 %v1855_v60  ;;  %v1856_v13 = vadd.f32 1e-12, %v1854_v12 }
0x15da   :  { %4311 = vrsqrt.f32 %v1856_v13 }
0x15e2   :  { %v4310_v61 = vpop.eup %4309 }
0x15e3   :  { %v1859_v5 = vmul.f32 %v4310_v61, %v4864_v25  ;;  %v4028_v25 = vld [vmem:[%s5057_s7 + $0x2c] ss:$16 sps:$4 sm:$0xff]  }
0x15e4   :  { %v4312_v0 = vpop.eup %4311 }
0x15e5   :  { %v1860_v2 = vmul.f32 %v4312_v0, %v4866_v8  ;;  %v1865_v49 = vmul.f32 %v1864_v63, %v1859_v5  ;;  %v4037_v8 = vld [vmem:[#allocation2 + $0x24] ss:$16 sps:$4 sm:$0xff]  }
0x15e7   :  { %v1866_v51 = vmul.f32 %v1864_v63, %v1860_v2  ;;  %v1871_v10 = vadd.f32 %v1870_v3, %v1865_v49  ;;  %v4926_v2 = vld [vmem:[%s5060_s10 + $0x18] sm:$0xff] }
0x15e9   :  { %v1872_v6 = vadd.f32 %v1870_v3, %v1866_v51  ;;  %v4125_v51 = vld [vmem:[#allocation2 + $0x200] ss:$16 sps:$4 sm:$0xff]  }
0x15eb   :  { %v1874_v7 = vrot.slane %v1872_v6, 7  ;;  %v4128_v6 = vld [vmem:[#allocation2 + $0x208] ss:$16 sps:$4 sm:$0xff]  }
0x15ed   :  { %v1877_v53 = vsel %vm1876_vm5, %v1871_v10, %v1874_v7  ;;  %v1902_v10 = vrot.slane %v4926_v2, %v4473_v39 }
0x15ee   :  { %v1878_v46 = vpack.c.bf16 %v1877_v53, %v1877_v53  ;;  %v4133_v53 = vld [vmem:[#allocation2 + $0x224] ss:$16 sps:$4 sm:$0xff]  }
0x15f0   :  { %3490 = vmatmul.mubr.msk.bf16.vlgmr.msra.gmra.mrb[44].mxu1 %vm59_vm0, %v1878_v46 }
0x15f1   :  { %1988 = vmatpush1.bf16.msra.mxu1 %v4023_v30  ;;  %2019 = vmatprep.mubr.bf16.mxu1 %v4351_v40  ;;  %v4053_v40 = vld [vmem:[#allocation2 + $0x80] ss:$16 sps:$4 sm:$0xff]   ;;  %v4136_v30 = vld [vmem:[#allocation2 + $0x22c] ss:$16 sps:$4 sm:$0xff]  }
0x15f2   :  { %1989 = vmatprep.subr.bf16.mxu1 %v4028_v25 }
0x15f5   :  { %1990 = vmatpush1.bf16.msra.mxu1 %v4026_v24 }
0x15f6   :  { %2820 = vmatprep.subr.bf16.mxu1 %v4031_v4 }
0x15f8   :  { %3491 = vmatmul.mubr.msk.bf16.vlgmr.msra.gmra.mrb[48].mxu1 %vm59_vm0, %v1878_v46 }
0x15f9   :  { %2821 = vmatpush1.bf16.msra.mxu1 %v4029_v16  ;;  %v4131_v16 = vld [vmem:[#allocation2 + $0x220] ss:$16 sps:$4 sm:$0xff]  }
0x15fa   :  { %2822 = vmatprep.subr.bf16.mxu1 %v4037_v8  ;;  %v4134_v8 = vld [vmem:[#allocation2 + $0x228] ss:$16 sps:$4 sm:$0xff]  }
0x15fd   :  { %2823 = vmatpush1.bf16.msra.mxu1 %v4035_v9 }
0x15fe   :  { %2824 = vmatprep.subr.bf16.mxu1 %v4043_v11  ;;  %v4139_v11 = vld [vmem:[#allocation2 + $0x244] ss:$16 sps:$4 sm:$0xff]  }
0x1601   :  { %2825 = vmatpush1.bf16.msra.mxu1 %v4041_v14  ;;  %v4142_v14 = vld [vmem:[#allocation2 + $0x24c] ss:$16 sps:$4 sm:$0xff]  }
0x1602   :  { %2826 = vmatprep.subr.bf16.mxu1 %v4049_v23 }
0x1605   :  { %2827 = vmatpush1.bf16.msra.mxu1 %v4047_v26 }
0x1606   :  { %2828 = vmatprep.subr.bf16.mxu1 %v4055_v41  ;;  %v4137_v41 = vld [vmem:[#allocation2 + $0x240] ss:$16 sps:$4 sm:$0xff]  }
0x1609   :  { %2829 = vmatpush1.bf16.msra.mxu1 %v4053_v40  ;;  %v4140_v40 = vld [vmem:[#allocation2 + $0x248] ss:$16 sps:$4 sm:$0xff]  }
0x160a   :  { %2830 = vmatprep.subr.bf16.mxu1 %v4061_v17  ;;  %v4145_v17 = vld [vmem:[#allocation2 + $0x264] ss:$16 sps:$4 sm:$0xff]  }
0x160d   :  { %2831 = vmatpush1.bf16.msra.mxu1 %v4059_v18  ;;  %v4148_v18 = vld [vmem:[#allocation2 + $0x26c] ss:$16 sps:$4 sm:$0xff]  }
0x160e   :  { %2832 = vmatprep.subr.bf16.mxu1 %v4067_v19  ;;  %v4143_v19 = vld [vmem:[#allocation2 + $0x260] ss:$16 sps:$4 sm:$0xff]  }
0x1611   :  { %2833 = vmatpush1.bf16.msra.mxu1 %v4065_v20  ;;  %v4146_v20 = vld [vmem:[#allocation2 + $0x268] ss:$16 sps:$4 sm:$0xff]  }
0x1612   :  { %2834 = vmatprep.subr.bf16.mxu1 %v4073_v36  ;;  %v4151_v36 = vld [vmem:[#allocation2 + $0x284] ss:$16 sps:$4 sm:$0xff]  }
0x1615   :  { %2835 = vmatpush1.bf16.msra.mxu1 %v4071_v37  ;;  %v4154_v37 = vld [vmem:[#allocation2 + $0x28c] ss:$16 sps:$4 sm:$0xff]  }
0x1616   :  { %2836 = vmatprep.subr.bf16.mxu1 %v4079_v21  ;;  %v4149_v21 = vld [vmem:[#allocation2 + $0x280] ss:$16 sps:$4 sm:$0xff]  }
0x1619   :  { %2837 = vmatpush1.bf16.msra.mxu1 %v4077_v27  ;;  %v4152_v27 = vld [vmem:[#allocation2 + $0x288] ss:$16 sps:$4 sm:$0xff]  }
0x161a   :  { %2838 = vmatprep.subr.bf16.mxu1 %v4085_v29  ;;  %v4157_v29 = vld [vmem:[#allocation2 + $0x2a4] ss:$16 sps:$4 sm:$0xff]  }
0x161d   :  { %2839 = vmatpush1.bf16.msra.mxu1 %v4083_v32  ;;  %v4160_v32 = vld [vmem:[#allocation2 + $0x2ac] ss:$16 sps:$4 sm:$0xff]  }
0x161e   :  { %2840 = vmatprep.subr.bf16.mxu1 %v4091_v34  ;;  %v4155_v34 = vld [vmem:[#allocation2 + $0x2a0] ss:$16 sps:$4 sm:$0xff]  }
0x1621   :  { %2841 = vmatpush1.bf16.msra.mxu1 %v4089_v35  ;;  %v4158_v35 = vld [vmem:[#allocation2 + $0x2a8] ss:$16 sps:$4 sm:$0xff]  }
0x1622   :  { %2842 = vmatprep.subr.bf16.mxu1 %v4097_v38  ;;  %v4163_v38 = vld [vmem:[#allocation2 + $0x2c4] ss:$16 sps:$4 sm:$0xff]  }
0x1625   :  { %2843 = vmatpush1.bf16.msra.mxu1 %v4095_v42  ;;  %v4166_v42 = vld [vmem:[#allocation2 + $0x2cc] ss:$16 sps:$4 sm:$0xff]  }
0x1626   :  { %2844 = vmatprep.subr.bf16.mxu1 %v4103_v43  ;;  %v4161_v43 = vld [vmem:[#allocation2 + $0x2c0] ss:$16 sps:$4 sm:$0xff]  }
0x1629   :  { %2845 = vmatpush1.bf16.msra.mxu1 %v4101_v44  ;;  %v4164_v44 = vld [vmem:[#allocation2 + $0x2c8] ss:$16 sps:$4 sm:$0xff]  }
0x162a   :  { %2846 = vmatprep.subr.bf16.mxu1 %v4109_v15  ;;  %v4169_v15 = vld [vmem:[#allocation2 + $0x2e4] ss:$16 sps:$4 sm:$0xff]  }
0x162d   :  { %2847 = vmatpush1.bf16.msra.mxu1 %v4107_v45  ;;  %v4172_v45 = vld [vmem:[#allocation2 + $0x2ec] ss:$16 sps:$4 sm:$0xff]  }
0x162e   :  { %2848 = vmatprep.subr.bf16.mxu1 %v4115_v47  ;;  %v4167_v47 = vld [vmem:[#allocation2 + $0x2e0] ss:$16 sps:$4 sm:$0xff]  }
0x1631   :  { %2849 = vmatpush1.bf16.msra.mxu1 %v4113_v54  ;;  %v4175_v54 = vld [vmem:[#allocation2 + $0x304] ss:$16 sps:$4 sm:$0xff]  }
0x1632   :  { %2850 = vmatprep.subr.bf16.mxu1 %v4121_v28  ;;  %v4173_v28 = vld [vmem:[#allocation2 + $0x300] ss:$16 sps:$4 sm:$0xff]  }
0x1635   :  { %2851 = vmatpush1.bf16.msra.mxu1 %v4119_v56  ;;  %v4181_v56 = vld [vmem:[#allocation2 + $0x324] ss:$16 sps:$4 sm:$0xff]  }
0x1636   :  { %2861 = vmatprep.subr.bf16.mxu1 %v4127_v57  ;;  %v4179_v57 = vld [vmem:[#allocation2 + $0x320] ss:$16 sps:$4 sm:$0xff]  }
0x16c3   :  { %v1980_v60 = vpop.f32.mrb[44].mxu1 }
0x16c4   :  { %v1981_v12 = vadd.f32 %v1980_v60, %v1890_v48  ;;  %v1982_v13 = vpop.f32.mrb[45].mxu1  ;;  %v4187_v48 = vld [vmem:[#allocation2 + $0x344] ss:$16 sps:$4 sm:$0xff]   ;;  %v4185_v60 = vld [vmem:[#allocation2 + $0x340] ss:$16 sps:$4 sm:$0xff]  }
0x16c5   :  { %v1983_v61 = vadd.f32 %v1982_v13, %v1894_v50  ;;  %v1984_v63 = vpop.f32.mrb[46].mxu1  ;;  %v4190_v50 = vld [vmem:[#allocation2 + $0x34c] ss:$16 sps:$4 sm:$0xff]   ;;  %v4193_v13 = vld [vmem:[#allocation2 + $0x364] ss:$16 sps:$4 sm:$0xff]  }
0x16c6   :  { %v2028_v5 = vmax.f32 %v1981_v12, 0.0  ;;  %v1985_v0 = vpop.f32.mrb[47].mxu1  ;;  %v4188_v12 = vld [vmem:[#allocation2 + $0x348] ss:$16 sps:$4 sm:$0xff]   ;;  %v4191_v63 = vld [vmem:[#allocation2 + $0x360] ss:$16 sps:$4 sm:$0xff]  }
0x16c7   :  { %v2029_v3 = vmax.f32 %v1983_v61, 0.0  ;;  %v4196_v61 = vld [vmem:[#allocation2 + $0x36c] ss:$16 sps:$4 sm:$0xff]   ;;  %v4199_v0 = vld [vmem:[#allocation2 + $0x384] ss:$16 sps:$4 sm:$0xff]  }
0x16c8   :  { %v2032_v7 = vpack.c.bf16 %v2028_v5, %v2028_v5  ;;  %v4194_v5 = vld [vmem:[#allocation2 + $0x368] ss:$16 sps:$4 sm:$0xff]  }
0x16c9   :  { %v2033_v49 = vpack.c.bf16 %v2029_v3, %v2029_v3  ;;  %v4202_v3 = vld [vmem:[#allocation2 + $0x38c] ss:$16 sps:$4 sm:$0xff]  }
0x16cb   :  { %v4930_v46 = vpop.f32.mrb[48].mxu1  ;;  %2852 = vmatprep.mubr.bf16.mxu1 %v2033_v49  ;;  %2934 = vmatprep.mubr.bf16.mxu0 %v2033_v49  ;;  %v4197_v49 = vld [vmem:[#allocation2 + $0x380] ss:$16 sps:$4 sm:$0xff]  }
0x16cc   :  { %v2023_v25 = vpop.f32.mrb[49].mxu1  ;;  %2853 = vmatmul.mubr.bf16.vlgmr.msra.gmra.mrb[52].mxu1 %v2032_v7  ;;  %2935 = vmatmul.mubr.bf16.vlgmr.msra.gmra.mrb[52].mxu0 %v2032_v7  ;;  %v4935_v7 = vld [vmem:[%s5060_s10 + $0x10] sm:$0xff] }
0x16cd   :  { %v2024_v24 = vadd.f32 %v2023_v25, %v1902_v10  ;;  %2862 = vmatpush1.bf16.msra.mxu1 %v4125_v51  ;;  %2944 = vmatpush1.bf16.msra.mxu0 %v4128_v6  ;;  %v2025_v4 = vpop.f32.mrb[50].mxu1  ;;  %v4200_v51 = vld [vmem:[#allocation2 + $0x388] ss:$16 sps:$4 sm:$0xff]   ;;  %v4205_v6 = vld [vmem:[#allocation2 + $0x3a4] ss:$16 sps:$4 sm:$0xff]   ;;  %v1898_v25 = vrot.slane %v4935_v7, %v4473_v39 }
0x16ce   :  { %v2026_v9 = vpop.f32.mrb[51].mxu1  ;;  %2863 = vmatprep.subr.bf16.mxu1 %v4133_v53  ;;  %2945 = vmatprep.subr.bf16.mxu0 %v4136_v30  ;;  %v4208_v10 = vld [vmem:[#allocation2 + $0x3ac] ss:$16 sps:$4 sm:$0xff]   ;;  %v4203_v53 = vld [vmem:[#allocation2 + $0x3a0] ss:$16 sps:$4 sm:$0xff]  }
0x16cf   :  { %v2031_v23 = vmax.f32 %v2024_v24, 0.0  ;;  %v4206_v30 = vld [vmem:[#allocation2 + $0x3a8] ss:$16 sps:$4 sm:$0xff]   ;;  %v4211_v24 = vld [vmem:[#allocation2 + $0x3c4] ss:$16 sps:$4 sm:$0xff]   ;;  %v2022_v9 = vadd.f32 %v4930_v46, %v1898_v25 }
0x16d0   :  { %v4214_v4 = vld [vmem:[#allocation2 + $0x3cc] ss:$16 sps:$4 sm:$0xff]   ;;  %v4221_v39 = vld [vmem:[%s5059_s9 + $0x40] sm:$0xff]  }
0x16d1   :  { %v2035_v26 = vpack.c.bf16 %v2031_v23, %v2031_v23  ;;  %2864 = vmatpush1.bf16.msra.mxu1 %v4131_v16  ;;  %2946 = vmatpush1.bf16.msra.mxu0 %v4134_v8  ;;  %v4209_v16 = vld [vmem:[#allocation2 + $0x3c0] ss:$16 sps:$4 sm:$0xff]   ;;  %v4212_v8 = vld [vmem:[#allocation2 + $0x3c8] ss:$16 sps:$4 sm:$0xff]  }
0x16d2   :  { %2865 = vmatprep.subr.bf16.mxu1 %v4139_v11  ;;  %2947 = vmatprep.subr.bf16.mxu0 %v4142_v14  ;;  %v4217_v11 = vld [vmem:[#allocation2 + $0x3e4] ss:$16 sps:$4 sm:$0xff]   ;;  %v4220_v14 = vld [vmem:[#allocation2 + $0x3ec] ss:$16 sps:$4 sm:$0xff]   ;;  %v4215_v23 = vld [vmem:[#allocation2 + $0x3e0] ss:$16 sps:$4 sm:$0xff]  }
0x16d3   :  { %2893 = vmatprep.mubr.bf16.mxu1 %v2035_v26  ;;  %2975 = vmatprep.mubr.bf16.mxu0 %v2035_v26  ;;  %v4218_v26 = vld [vmem:[#allocation2 + $0x3e8] ss:$16 sps:$4 sm:$0xff]   ;;  %v4223_v46 = vld [vmem:[%s5059_s9] sm:$0xff]  }
0x16d5   :  { %2866 = vmatpush1.bf16.msra.mxu1 %v4137_v41  ;;  %2948 = vmatpush1.bf16.msra.mxu0 %v4140_v40  ;;  %v2030_v41 = vmax.f32 %v2022_v9, 0.0  ;;  %v4222_v40 = vld [vmem:[%s5059_s9 + $0xc0] sm:$0xff]  }
0x16d6   :  { %2867 = vmatprep.subr.bf16.mxu1 %v4145_v17  ;;  %2949 = vmatprep.subr.bf16.mxu0 %v4148_v18  ;;  %v4224_v17 = vld [vmem:[%s5059_s9 + $0x80] sm:$0xff]  }
0x16d7   :  { %v2034_v18 = vpack.c.bf16 %v2030_v41, %v2030_v41 }
0x16d9   :  { %2868 = vmatpush1.bf16.msra.mxu1 %v4143_v19  ;;  %2950 = vmatpush1.bf16.msra.mxu0 %v4146_v20  ;;  %v4225_v19 = vld [vmem:[%s5059_s9 + $0x48] sm:$0xff]  }
0x16da   :  { %2869 = vmatprep.subr.bf16.mxu1 %v4151_v36  ;;  %2951 = vmatprep.subr.bf16.mxu0 %v4154_v37  ;;  %v4226_v20 = vld [vmem:[%s5059_s9 + $0xc8] sm:$0xff]  }
0x16db   :  { %v4227_v36 = vld [vmem:[%s5059_s9 + $0x8] sm:$0xff]  }
0x16dc   :  { %v4228_v37 = vld [vmem:[%s5059_s9 + $0x88] sm:$0xff]  }
0x16dd   :  { %2870 = vmatpush1.bf16.msra.mxu1 %v4149_v21  ;;  %2952 = vmatpush1.bf16.msra.mxu0 %v4152_v27  ;;  %v4229_v21 = vld [vmem:[%s5059_s9 + $0x50] sm:$0xff]  }
0x16de   :  { %2871 = vmatprep.subr.bf16.mxu1 %v4157_v29  ;;  %2953 = vmatprep.subr.bf16.mxu0 %v4160_v32  ;;  %v4230_v27 = vld [vmem:[%s5059_s9 + $0xd0] sm:$0xff]  }
0x16df   :  { %v4231_v29 = vld [vmem:[%s5059_s9 + $0x10] sm:$0xff]  }
0x16e0   :  { %v4232_v32 = vld [vmem:[%s5059_s9 + $0x90] sm:$0xff]  }
0x16e1   :  { %2872 = vmatpush1.bf16.msra.mxu1 %v4155_v34  ;;  %2954 = vmatpush1.bf16.msra.mxu0 %v4158_v35  ;;  %v4233_v34 = vld [vmem:[%s5059_s9 + $0x58] sm:$0xff]  }
0x16e2   :  { %2873 = vmatprep.subr.bf16.mxu1 %v4163_v38  ;;  %2955 = vmatprep.subr.bf16.mxu0 %v4166_v42  ;;  %v4234_v35 = vld [vmem:[%s5059_s9 + $0xd8] sm:$0xff]  }
0x16e3   :  { %v4235_v38 = vld [vmem:[%s5059_s9 + $0x18] sm:$0xff]  }
0x16e4   :  { %v4236_v42 = vld [vmem:[%s5059_s9 + $0x98] sm:$0xff]  }
0x16e5   :  { %2874 = vmatpush1.bf16.msra.mxu1 %v4161_v43  ;;  %2956 = vmatpush1.bf16.msra.mxu0 %v4164_v44  ;;  %v4237_v43 = vld [vmem:[%s5059_s9 + $0x60] sm:$0xff]  }
0x16e6   :  { %2875 = vmatprep.subr.bf16.mxu1 %v4169_v15  ;;  %2957 = vmatprep.subr.bf16.mxu0 %v4172_v45  ;;  %v4238_v44 = vld [vmem:[%s5059_s9 + $0xe0] sm:$0xff]  }
0x16e7   :  { %v4239_v15 = vld [vmem:[%s5059_s9 + $0x20] sm:$0xff]  }
0x16e8   :  { %v4240_v45 = vld [vmem:[%s5059_s9 + $0xa0] sm:$0xff]  }
0x16e9   :  { %2876 = vmatpush1.bf16.msra.mxu1 %v4167_v47  ;;  %2958 = vmatpush1.bf16.msra.mxu0 %v4170_v52  ;;  %v4241_v47 = vld [vmem:[%s5059_s9 + $0x68] sm:$0xff]  }
0x16ea   :  { %2877 = vmatprep.subr.bf16.mxu1 %v4175_v54  ;;  %2959 = vmatprep.subr.bf16.mxu0 %v4178_v55  ;;  %v4242_v52 = vld [vmem:[%s5059_s9 + $0xe8] sm:$0xff]  }
0x16eb   :  { %v4243_v54 = vld [vmem:[%s5059_s9 + $0x28] sm:$0xff]  }
0x16ec   :  { %v4244_v55 = vld [vmem:[%s5059_s9 + $0xa8] sm:$0xff]  }
0x16ed   :  { %2878 = vmatpush1.bf16.msra.mxu1 %v4173_v28  ;;  %2960 = vmatpush1.bf16.msra.mxu0 %v4176_v62  ;;  %v4245_v28 = vld [vmem:[%s5059_s9 + $0x70] sm:$0xff]  }
0x16ee   :  { %2879 = vmatprep.subr.bf16.mxu1 %v4181_v56  ;;  %2961 = vmatprep.subr.bf16.mxu0 %v4184_v31  ;;  %v4246_v62 = vld [vmem:[%s5059_s9 + $0xf0] sm:$0xff]  }
0x16ef   :  { %v4247_v56 = vld [vmem:[%s5059_s9 + $0x30] sm:$0xff]  }
0x16f0   :  { %v4248_v31 = vld [vmem:[%s5059_s9 + $0xb0] sm:$0xff]  }
0x16f1   :  { %2880 = vmatpush1.bf16.msra.mxu1 %v4179_v57  ;;  %2962 = vmatpush1.bf16.msra.mxu0 %v4182_v22  ;;  %v4249_v57 = vld [vmem:[%s5059_s9 + $0x78] sm:$0xff]  }
0x16f2   :  { %2881 = vmatprep.subr.bf16.mxu1 %v4187_v48  ;;  %2963 = vmatprep.subr.bf16.mxu0 %v4190_v50  ;;  %v4250_v22 = vld [vmem:[%s5059_s9 + $0xf8] sm:$0xff]  }
0x16f3   :  { %v4251_v48 = vld [vmem:[%s5059_s9 + $0x38] sm:$0xff]  }
0x16f4   :  { %v4252_v50 = vld [vmem:[%s5059_s9 + $0xb8] sm:$0xff]   ;;  %s4352_s9 = smov 123  }
0x16f5   :  { %2882 = vmatpush1.bf16.msra.mxu1 %v4185_v60  ;;  %2964 = vmatpush1.bf16.msra.mxu0 %v4188_v12  ;;  %v2167_v60 = vrot.slane %v4917_v59, %v4595_v1  ;;  %v2175_v12 = vrot.slane %v4935_v7, %v4595_v1 }
0x16f6   :  { %2883 = vmatprep.subr.bf16.mxu1 %v4193_v13  ;;  %2965 = vmatprep.subr.bf16.mxu0 %v4196_v61  ;;  %v2171_v13 = vrot.slane %v4912_v58, %v4595_v1  ;;  %v2179_v61 = vrot.slane %v4926_v2, %v4595_v1 }
0x16f9   :  { %2884 = vmatpush1.bf16.msra.mxu1 %v4191_v63  ;;  %2966 = vmatpush1.bf16.msra.mxu0 %v4194_v5 }
0x16fa   :  { %2885 = vmatprep.subr.bf16.mxu1 %v4199_v0  ;;  %2967 = vmatprep.subr.bf16.mxu0 %v4202_v3 }
0x16fd   :  { %2886 = vmatpush1.bf16.msra.mxu1 %v4197_v49  ;;  %2968 = vmatpush1.bf16.msra.mxu0 %v4200_v51 }
0x16fe   :  { %2887 = vmatprep.subr.bf16.mxu1 %v4205_v6  ;;  %2969 = vmatprep.subr.bf16.mxu0 %v4208_v10 }
0x1701   :  { %2888 = vmatpush1.bf16.msra.mxu1 %v4203_v53  ;;  %2970 = vmatpush1.bf16.msra.mxu0 %v4206_v30 }
0x1702   :  { %2889 = vmatprep.subr.bf16.mxu1 %v4211_v24  ;;  %2971 = vmatprep.subr.bf16.mxu0 %v4214_v4 }
0x1705   :  { %2890 = vmatpush1.bf16.msra.mxu1 %v4209_v16  ;;  %2972 = vmatpush1.bf16.msra.mxu0 %v4212_v8 }
0x1706   :  { %2891 = vmatprep.subr.bf16.mxu1 %v4217_v11  ;;  %2973 = vmatprep.subr.bf16.mxu0 %v4220_v14 }
0x1709   :  { %2892 = vmatpush1.bf16.msra.mxu1 %v4215_v23  ;;  %2974 = vmatpush1.bf16.msra.mxu0 %v4218_v26  ;;  %v3059_v23 = vrot.slane %v4917_v59, %v4614_v33 }
0x170a   :  { %3724 = vmatprep.subr.bf16.mxu1 %v4221_v39  ;;  %3746 = vmatprep.subr.bf16.mxu0 %v4222_v40 }
0x170c   :  { %2894 = vmatmul.mubr.bf16.vlgmr.msra.gmra.mrb[52].mxu1 %v2034_v18  ;;  %2976 = vmatmul.mubr.bf16.vlgmr.msra.gmra.mrb[52].mxu0 %v2034_v18 }
0x170d   :  { %3725 = vmatpush3.bf16.msra.mxu1 %v4223_v46  ;;  %3747 = vmatpush3.bf16.msra.mxu0 %v4224_v17 }
0x170e   :  { %3726 = vmatprep.subr.bf16.mxu1 %v4225_v19  ;;  %3748 = vmatprep.subr.bf16.mxu0 %v4226_v20 }
0x1711   :  { %3727 = vmatpush3.bf16.msra.mxu1 %v4227_v36  ;;  %3749 = vmatpush3.bf16.msra.mxu0 %v4228_v37 }
0x1712   :  { %3728 = vmatprep.subr.bf16.mxu1 %v4229_v21  ;;  %3750 = vmatprep.subr.bf16.mxu0 %v4230_v27 }
0x1715   :  { %3729 = vmatpush3.bf16.msra.mxu1 %v4231_v29  ;;  %3751 = vmatpush3.bf16.msra.mxu0 %v4232_v32 }
0x1716   :  { %3730 = vmatprep.subr.bf16.mxu1 %v4233_v34  ;;  %3752 = vmatprep.subr.bf16.mxu0 %v4234_v35  ;;  %v3334_v34 = vrot.slane %v4917_v59, 3 }
0x1719   :  { %3731 = vmatpush3.bf16.msra.mxu1 %v4235_v38  ;;  %3753 = vmatpush3.bf16.msra.mxu0 %v4236_v42 }
0x171a   :  { %3732 = vmatprep.subr.bf16.mxu1 %v4237_v43  ;;  %3754 = vmatprep.subr.bf16.mxu0 %v4238_v44 }
0x171d   :  { %3733 = vmatpush3.bf16.msra.mxu1 %v4239_v15  ;;  %3755 = vmatpush3.bf16.msra.mxu0 %v4240_v45 }
0x171e   :  { %3734 = vmatprep.subr.bf16.mxu1 %v4241_v47  ;;  %3756 = vmatprep.subr.bf16.mxu0 %v4242_v52 }
0x1721   :  { %3735 = vmatpush3.bf16.msra.mxu1 %v4243_v54  ;;  %3757 = vmatpush3.bf16.msra.mxu0 %v4244_v55 }
0x1722   :  { %3736 = vmatprep.subr.bf16.mxu1 %v4245_v28  ;;  %3758 = vmatprep.subr.bf16.mxu0 %v4246_v62 }
0x1725   :  { %3737 = vmatpush3.bf16.msra.mxu1 %v4247_v56  ;;  %3759 = vmatpush3.bf16.msra.mxu0 %v4248_v31 }
0x1726   :  { %3738 = vmatprep.subr.bf16.mxu1 %v4249_v57  ;;  %3760 = vmatprep.subr.bf16.mxu0 %v4250_v22 }
0x1729   :  { %3739 = vmatpush3.bf16.msra.mxu1 %v4251_v48  ;;  %3761 = vmatpush3.bf16.msra.mxu0 %v4252_v50 }
0x17df   :  { %v2895_v63 = vpop.f32.mrb[52].mxu1  ;;  %v2977_v5 = vpop.f32.mrb[52].mxu0 }
0x17e0   :  { %v3952_v0 = vadd.f32 %v2895_v63, %v2167_v60  ;;  %v3954_v3 = vadd.f32 %v2977_v5, %v2175_v12  ;;  %v2897_v49 = vpop.f32.mrb[53].mxu1  ;;  %v2979_v51 = vpop.f32.mrb[53].mxu0 }
0x17e1   :  { %v3953_v6 = vadd.f32 %v2897_v49, %v2171_v13  ;;  %v3955_v10 = vadd.f32 %v2979_v51, %v2179_v61  ;;  %v2899_v53 = vpop.f32.mrb[54].mxu1  ;;  %v2981_v30 = vpop.f32.mrb[54].mxu0 }
0x17e2   :  { %v2984_v25 = vmax.f32 %v3952_v0, 0.0  ;;  %v2986_v24 = vmax.f32 %v3954_v3, 0.0  ;;  %v2900_v4 = vpop.f32.mrb[55].mxu1  ;;  %v2982_v7 = vpop.f32.mrb[55].mxu0 }
0x17e3   :  { %v2985_v16 = vmax.f32 %v3953_v6, 0.0  ;;  %v2987_v8 = vmax.f32 %v3955_v10, 0.0 }
0x17e4   :  { %v2988_v11 = vpack.c.bf16 %v2984_v25, %v2984_v25  ;;  %v2990_v1 = vpack.c.bf16 %v2986_v24, %v2986_v24 }
0x17e5   :  { %v2989_v58 = vpack.c.bf16 %v2985_v16, %v2985_v16  ;;  %v2991_v9 = vpack.c.bf16 %v2987_v8, %v2987_v8 }
0x17e7   :  { %3284 = vmatprep.mubr.bf16.mxu1 %v2989_v58  ;;  %3324 = vmatprep.mubr.bf16.mxu0 %v2991_v9 }
0x17e8   :  { %3285 = vmatmul.mubr.bf16.vlgmr.msra.gmra.mrb[56].mxu1 %v2988_v11  ;;  %3325 = vmatmul.mubr.bf16.vlgmr.msra.gmra.mrb[56].mxu0 %v2990_v1 }
0x18bb   :  { %v3740_v2 = vpop.f32.mrb[56].mxu1  ;;  %v3762_v14 = vpop.f32.mrb[56].mxu0 }
0x18bc   :  { %v3741_v26 = vpop.f32.mrb[57].mxu1  ;;  %v3763_v41 = vpop.f32.mrb[57].mxu0 }
0x18bd   :  { %v3742_v39 = vadd.f32 %v3741_v26, %v3740_v2  ;;  %v3764_v40 = vadd.f32 %v3763_v41, %v3762_v14  ;;  %v3743_v46 = vpop.f32.mrb[58].mxu1  ;;  %v3765_v17 = vpop.f32.mrb[58].mxu0 }
0x18be   :  { %v3744_v18 = vpop.f32.mrb[59].mxu1  ;;  %v3766_v19 = vpop.f32.mrb[59].mxu0 }
0x18bf   :  { %v3287_v20 = vadd.f32 %v3742_v39, %v3059_v23 }
0x18c1   :  { %v3327_v36 = vadd.f32 %v3764_v40, %v3287_v20 }
0x18c3   :  { %v3338_v37 = vand.u32 2147483647, %v3327_v36  ;;  %v3332_v33 = vmax.f32 %v3327_v36, 0.0  ;;  %v3336_v35 = vmul.f32 %v3334_v34, %v3327_v36 }
0x18c5   :  { %v3339_v21 = vsub.f32 0.0, %v3338_v37  ;;  %v3337_v42 = vsub.f32 %v3332_v33, %v3336_v35 }
0x18c7   :  { %v3340_v27 = vmul.f32 1.442695, %v3339_v21 }
0x18c9   :  { %4313 = vpow2.f32 %v3340_v27 }
0x18d3   :  { %v4314_v29 = vpop.eup %4313 }
0x18d4   :  { %v3342_v32 = vadd.f32 1.0, %v4314_v29 }
0x18d6   :  { %4315 = vlog2.f32 %v3342_v32 }
0x18e0   :  { %v4316_v38 = vpop.eup %4315 }
0x18e1   :  { %v3344_v43 = vmul.f32 0.6931472, %v4316_v38 }
0x18e3   :  { %v3345_v44 = vadd.f32 %v3344_v43, %v3337_v42 }
0x18e5   :  { %3360 = vrot.lane.b32.xlu0 %v3345_v44, %s4352_s9  ;;  %v3347_v15 = vsel %vm3346_vm6, %v3345_v44, 0.0 }
0x18e6   :  { %3348 = vadd.xlane.f32.xlu1 %v3347_v15 }
0x1957   :  { %v3361_v45 = vpop.permute.xlu0 %3360 }
0x1958   :  { %v3364_v47 = vsel %vm3363_vm7, %v3361_v45, 0.0 }
0x1959   :  { %3365 = vadd.xlane.f32.xlu1 %v3364_v47 }
0x1973   :  { %v3349_v52 = vpop.xlane.xlu1 %3348 }
0x1974   :  { %v3350_v54 = vrot.slane %v3349_v52, 4 }
0x1976   :  { %v3351_v55 = vadd.f32 %v3350_v54, %v3349_v52 }
0x1978   :  { %v3352_v28 = vrot.slane %v3351_v55, 2 }
0x197a   :  { %v3353_v59 = vadd.f32 %v3352_v28, %v3351_v55 }
0x197c   :  { %v3354_v62 = vrot.slane %v3353_v59, 1 }
0x197e   :  { %v3355_v56 = vadd.f32 %v3354_v62, %v3353_v59 }
0x1980   :  { %3964 = vpush %v3355_v56 }
0x19b1   :  { %s3965_s2 = spop %3964 }
0x19b2   :  { %v3357_v13 = vstv %s3965_s2 }
0x19b3   :  { %v3358_v63 = vmul.f32 0.1, %v3357_v13 }
0x19e6   :  { %v3366_v31 = vpop.xlane.xlu1 %3365 }
0x19e7   :  { %v3367_v57 = vrot.slane %v3366_v31, 4 }
0x19e9   :  { %v3368_v22 = vadd.f32 %v3367_v57, %v3366_v31 }
0x19eb   :  { %v3369_v48 = vrot.slane %v3368_v22, 2 }
0x19ed   :  { %v3370_v50 = vadd.f32 %v3369_v48, %v3368_v22 }
0x19ef   :  { %v3371_v60 = vrot.slane %v3370_v50, 1 }
0x19f1   :  { %v3372_v12 = vadd.f32 %v3371_v60, %v3370_v50 }
0x19f3   :  { %3966 = vpush %v3372_v12 }
0x1a24   :  { %s3967_s16 = spop %3966 }
0x1a25   :  { %v3374_v61 = vstv %s3967_s16 }
0x1a26   :  { %v3375_v5 = vmul.f32 0.16666667, %v3374_v61 }
0x1a28   :  { %v3376_v0 = vadd.f32 %v3375_v5, %v3358_v63  ;;  %v3378_v3 = vsel %vm3377_vm8, %v3358_v63, %v3375_v5 }
0x1a2a   :  { %v3380_v49 = vsel %vm3379_vm9, %v3378_v3, %v3376_v0 }
0x1a2b   :  { %v3382_v51 = vsel %vm3381_vm10, %v3380_v49, 0.0 }
0x1a2c   :  { %v3384_v6 = vrot.slane %v3382_v51, 6 }
0x1a2e   :  { %v3387_v10 = vsel %vm3386_vm11, %v3327_v36, %v3384_v6 }
0x1a2f   :  { %3388 = vst [vmem:[%s5061_s11] sm:$0x7] %v3387_v10 }
0x1a30   :  { %3393 = vsyncpa [#allocation3], 1 }

</bundles_post_ra>
